<compile_context>
chip_gen: v5e
topology: v5e:2x2
jax: 0.10.0
libtpu: 0.0.40
codegen_flags: <defaults>
</compile_context>

<pallas_src>
import functools

import jax
import jax.numpy as jnp
from jax import lax
from jax.experimental import pallas as pl
from jax.experimental.pallas import tpu as pltpu


# ----------------------------------------------------------------------------
# Resident kernel: x fits in VMEM, all EM stages in one invocation.
# ----------------------------------------------------------------------------
def _dfc_em_resident_kernel(x_cn_ref, protot_ref, cluster_ref, protot_out_ref, *,
                            stage_num: int, unroll: bool):
    x_cn = x_cn_ref[...]                       # (C, N) bf16
    protot0 = protot_ref[...]                  # (K, C) f32
    k = protot0.shape[0]
    n = x_cn.shape[1]

    def stage(_, carry):
        _, protot = carry
        # similarity.T = prototype.T @ x -> (K, N), tokens on lanes.
        s = jnp.dot(protot.astype(jnp.bfloat16), x_cn,
                    preferred_element_type=jnp.float32)                # (K, N) f32

        # softmax over clusters (== torch softmax(dim=-1) on the (N, K) view)
        m = jnp.max(s, axis=0, keepdims=True)
        e = jnp.exp(s - m)
        simt = e * pl.reciprocal(jnp.sum(e, axis=0, keepdims=True), approx=True)

        # The reference's first normalization sim / (1e-6 + sim.sum(0)) is a positive
        # per-cluster factor that cancels in the threshold test and in the final
        # renormalization, so it is dropped.
        thr = (jnp.max(simt, axis=1, keepdims=True) * 0.5
               + jnp.min(simt, axis=1, keepdims=True) * 0.5)           # (K, 1)
        wt = jnp.where(simt < thr, 0.0, simt)                          # (K, N), unnormalized
        rowsum = jnp.sum(wt, axis=1, keepdims=True)                    # (K, 1)

        # prototype.T = (x @ w).T : contract the token axis of both operands.
        # Renormalization applied AFTER the matmul on the (K, C) f32 result
        # (linear, so it commutes exactly) -- saves a (K, N) VPU multiply and lets
        # the XLU row-sum / EUP reciprocal overlap the MXU matmul.
        proto_un = lax.dot_general(
            wt.astype(jnp.bfloat16), x_cn,
            dimension_numbers=(((1,), (1,)), ((), ())),
            preferred_element_type=jnp.float32)                        # (K, C)
        protot_new = proto_un * pl.reciprocal(rowsum, approx=True)
        return simt, protot_new

    simt0 = jnp.zeros((k, n), jnp.float32)
    simt, protot = lax.fori_loop(0, stage_num, stage, (simt0, protot0),
                                 unroll=unroll)

    # cluster = similarity.argmax(-1) from the LAST stage's similarity (i.e. the
    # prototypes before the last update), matching the torch loop; first index on ties.
    mx = jnp.max(simt, axis=0, keepdims=True)
    row = lax.broadcasted_iota(jnp.int32, simt.shape, 0)
    cand = jnp.where(simt == mx, row, k)
    cluster_ref[...] = jnp.min(cand, axis=0)[None, :]                  # (1, N) int32
    protot_out_ref[...] = protot


# ----------------------------------------------------------------------------
# Tiled / streaming kernel: grid = (stage, phase, token_tile).
#   phase 0: per-cluster max/min of the softmax over all token tiles.
#   phase 1: thresholded weights, prototype accumulation, post-matmul renorm.
# ----------------------------------------------------------------------------
def _dfc_em_tiled_kernel(x_cn_ref, protot_init_ref, cluster_ref, protot_out_ref,
                         protot_ref, stat_max_ref, stat_min_ref,
                         acc_proto_ref, acc_rowsum_ref):
    s = pl.program_id(0)           # EM stage
    p = pl.program_id(1)           # phase: 0 = stats sweep, 1 = update sweep
    t = pl.program_id(2)           # token tile
    n_tiles = pl.num_programs(2)
    k = protot_ref.shape[0]

    @pl.when((s == 0) & (p == 0) & (t == 0))
    def _():                                    # one-time prototype init
        protot_ref[...] = protot_init_ref[...]

    @pl.when((p == 0) & (t == 0))
    def _():                                    # per-stage stats init
        stat_max_ref[...] = jnp.full_like(stat_max_ref, -jnp.inf)
        stat_min_ref[...] = jnp.full_like(stat_min_ref, jnp.inf)

    @pl.when((p == 1) & (t == 0))
    def _():                                    # per-stage accumulator init
        acc_proto_ref[...] = jnp.zeros_like(acc_proto_ref)
        acc_rowsum_ref[...] = jnp.zeros_like(acc_rowsum_ref)

    x_cn = x_cn_ref[...]                                               # (C, tn) bf16
    protot = protot_ref[...]                                           # (K, C) f32
    sim = jnp.dot(protot.astype(jnp.bfloat16), x_cn,
                  preferred_element_type=jnp.float32)                  # (K, tn)
    m = jnp.max(sim, axis=0, keepdims=True)
    e = jnp.exp(sim - m)
    simt = e * pl.reciprocal(jnp.sum(e, axis=0, keepdims=True), approx=True)

    # Cluster id for this tile; intermediate stages overwrite it (like the torch
    # loop redrawing each iteration); the last stage's write is the returned one.
    # Lane-dense (1, tn >= 128) store.
    mx = jnp.max(simt, axis=0, keepdims=True)
    row = lax.broadcasted_iota(jnp.int32, simt.shape, 0)
    cand = jnp.where(simt == mx, row, k)
    cluster_ref[...] = jnp.min(cand, axis=0)[None, :]

    @pl.when(p == 0)
    def _():
        stat_max_ref[...] = jnp.maximum(stat_max_ref[...],
                                        jnp.max(simt, axis=1, keepdims=True))
        stat_min_ref[...] = jnp.minimum(stat_min_ref[...],
                                        jnp.min(simt, axis=1, keepdims=True))

    @pl.when(p == 1)
    def _():
        thr = stat_max_ref[...] * 0.5 + stat_min_ref[...] * 0.5        # (K, 1)
        wt = jnp.where(simt < thr, 0.0, simt)                          # (K, tn)
        acc_rowsum_ref[...] += jnp.sum(wt, axis=1, keepdims=True)
        acc_proto_ref[...] += lax.dot_general(
            wt.astype(jnp.bfloat16), x_cn,
            dimension_numbers=(((1,), (1,)), ((), ())),
            preferred_element_type=jnp.float32)                        # (K, C)

    @pl.when((p == 1) & (t == n_tiles - 1))
    def _():                                    # end of stage: post-matmul renorm
        new_protot = acc_proto_ref[...] * pl.reciprocal(acc_rowsum_ref[...],
                                                        approx=True)
        protot_ref[...] = new_protot
        protot_out_ref[...] = new_protot


# ----------------------------------------------------------------------------
# Wrapper
# ----------------------------------------------------------------------------
def _vmem_capacity_bytes():
    try:
        return int(pltpu.get_tpu_info().vmem_capacity_bytes)
    except Exception:
        return 64 * 1024 * 1024        # conservative: v7x per-TensorCore VMEM


def _vmem_limit_bytes(working_set_bytes, capacity):
    # double-buffered blocks + headroom for compiler temporaries; never request
    # more than 60% of physical VMEM and never less than 4 MiB.
    want = 2 * working_set_bytes + (2 << 20)
    return int(min(max(want, 4 << 20), int(capacity * 0.6)))


def _pick_tile_n(n):
    for t in (2048, 1024, 512, 256, 128):
        if n % t == 0:
            return t
    # TODO(synk): mask a ragged tail instead of falling back to one full-width tile.
    return n


def dfc_forward(x, prob, number_cluster, stage_num=10, *,
                force_tiled=False, tile_n=None):
    """x: (C, H, W) float32; prob: (Hp, Wp) float32.

    Returns (cluster (H, W) int32, prototype (C, K) float32)."""
    c, h, w = x.shape
    n = h * w
    k = number_cluster
    x2d = x.reshape(c, n).astype(jnp.float32)                          # (C, N)

    # F.interpolate(prob[None, None], (h, w), mode='bilinear'), align_corners=False
    prob_r = jax.image.resize(prob.astype(jnp.float32), (h, w),
                              method="bilinear", antialias=False)

    # topk(k=h*w) == descending order of all indices (tie order may differ from torch).
    order = jnp.argsort(-prob_r.reshape(-1))

    # Prototype init: stack(chunk(sorted_x, N//K), 0).mean(0) expressed as a
    # one-hot chunk-assignment matmul -- token at descending rank r contributes to
    # column r % K -- so the (C, N) sorted gather is never materialized.
    # (Assumes h*w divisible by number_cluster, as the torch reference requires.)
    num_chunks = n // k
    assign = jnp.zeros((n,), jnp.int32).at[order].set(
        jnp.arange(n, dtype=jnp.int32) % k)
    onehot = jax.nn.one_hot(assign, k, dtype=jnp.float32)              # (N, K)
    proto0 = (x2d @ onehot) * (1.0 / num_chunks)                       # (C, K)
    protot0 = proto0.T                                                 # (K, C) f32

    # Single resident copy of x, transposed and in bf16.
    # TODO(synk): at production sizes produce x in bf16 upstream (or fuse the cast
    # into the producer) to avoid this extra HBM pass.
    x_cn = x2d.astype(jnp.bfloat16)

    capacity = _vmem_capacity_bytes()
    # x (bf16) + ~3 (K,N) f32 EM temporaries + cluster + proto blocks.
    resident_ws = 2 * c * n + 3 * 4 * k * n + 4 * n + 2 * 4 * k * c
    use_tiled = force_tiled or (2 * resident_ws > int(capacity * 0.4))

    out_shape = (jax.ShapeDtypeStruct((1, n), jnp.int32),
                 jax.ShapeDtypeStruct((k, c), jnp.float32))

    if not use_tiled:
        kernel = functools.partial(
            _dfc_em_resident_kernel, stage_num=stage_num,
            unroll=(k * n <= 32 * 1024))   # don't fully unroll with large live tiles
        cluster_flat, protot = pl.pallas_call(
            kernel,
            out_shape=out_shape,
            grid=(1,),
            in_specs=[pl.BlockSpec((c, n), lambda i: (0, 0)),
                      pl.BlockSpec((k, c), lambda i: (0, 0))],
            out_specs=(pl.BlockSpec((1, n), lambda i: (0, 0)),
                       pl.BlockSpec((k, c), lambda i: (0, 0))),
            compiler_params=pltpu.CompilerParams(
                dimension_semantics=("arbitrary",),
                vmem_limit_bytes=_vmem_limit_bytes(resident_ws, capacity)),
        )(x_cn, protot0)
    else:
        tn = tile_n if tile_n is not None else _pick_tile_n(n)
        if n % tn != 0:
            tn = n
        n_tiles = n // tn
        tiled_ws = 2 * c * tn + 3 * 4 * k * tn + 4 * tn + 4 * 4 * k * c
        # TODO(synk): add a leading 'parallel' batch grid axis (or vmap) when
        # clustering multiple feature maps, to use v7x's second TensorCore and to
        # feed the MXU more than K rows per matmul.
        cluster_flat, protot = pl.pallas_call(
            _dfc_em_tiled_kernel,
            out_shape=out_shape,
            grid=(stage_num, 2, n_tiles),
            in_specs=[pl.BlockSpec((c, tn), lambda s, p, t: (0, t)),
                      pl.BlockSpec((k, c), lambda s, p, t: (0, 0))],
            out_specs=(pl.BlockSpec((1, tn), lambda s, p, t: (0, t)),
                       pl.BlockSpec((k, c), lambda s, p, t: (0, 0))),
            scratch_shapes=[
                pltpu.VMEM((k, c), jnp.float32),   # running prototype.T
                pltpu.VMEM((k, 1), jnp.float32),   # per-cluster max(softmax)
                pltpu.VMEM((k, 1), jnp.float32),   # per-cluster min(softmax)
                pltpu.VMEM((k, c), jnp.float32),   # prototype accumulator
                pltpu.VMEM((k, 1), jnp.float32),   # wt row-sum accumulator
            ],
            compiler_params=pltpu.CompilerParams(
                dimension_semantics=("arbitrary", "arbitrary", "arbitrary"),
                vmem_limit_bytes=_vmem_limit_bytes(tiled_ws, capacity)),
        )(x_cn, protot0)

    # TODO(synk): matplotlib visualization inside the torch loop (plt.imshow /
    # plt.pause) is pure side-effect and intentionally omitted.
    cluster = cluster_flat.reshape(h, w)                               # int32 (torch: int64)
    prototype = protot.T                                               # (C, K)
    return cluster, prototype


if __name__ == "__main__":
    key = jax.random.PRNGKey(0)
    kx, kp = jax.random.split(key)

    C, H, W = 32, 16, 16          # feature map: c h w
    K = 8                          # number_cluster (HW=256 divisible by K)
    x = jax.random.normal(kx, (C, H, W), dtype=jnp.float32)
    prob = jax.random.uniform(kp, (8, 8), dtype=jnp.float32)   # low-res prob map

    # Resident (VMEM-fitting) path.
    cluster, proto = dfc_forward(x, prob, number_cluster=K, stage_num=10)
    # Streamed / N-tiled production path, forced at demo size so it is exercised.
    cluster_t, proto_t = dfc_forward(x, prob, number_cluster=K, stage_num=10,
                                     force_tiled=True, tile_n=128)
    jax.block_until_ready((cluster, proto, cluster_t, proto_t))

    assert cluster.shape == (H, W) and proto.shape == (C, K)
    assert cluster_t.shape == (H, W) and proto_t.shape == (C, K)
    assert bool(jnp.all((cluster >= 0) & (cluster < K)))
    assert bool(jnp.all((cluster_t >= 0) & (cluster_t < K)))
    print("KERNEL_OK")
</pallas_src>

<mosaic_0001>
module attributes {stable_mosaic.version = 11 : i64} {
  func.func @_dfc_em_resident_kernel(%arg0: i32, %arg1: memref<32x256xbf16, #tpu.memory_space<vmem>>, %arg2: memref<8x32xf32, #tpu.memory_space<vmem>>, %arg3: memref<1x256xi32, #tpu.memory_space<vmem>>, %arg4: memref<8x32xf32, #tpu.memory_space<vmem>>) attributes {dimension_semantics = [#tpu.dimension_semantics<arbitrary>], iteration_bounds = array<i64: 1>, scalar_prefetch = 0 : i64, scratch_operands = 0 : i64, tpu.core_type = #tpu.core_type<tc>, window_params = [{pipeline_mode = #tpu.pipeline_mode<synchronous>, transform_indices = @transform_0, window_bounds = array<i64: 32, 256>}, {pipeline_mode = #tpu.pipeline_mode<synchronous>, transform_indices = @transform_1, window_bounds = array<i64: 8, 32>}, {pipeline_mode = #tpu.pipeline_mode<synchronous>, transform_indices = @transform_2, window_bounds = array<i64: 1, 256>}, {pipeline_mode = #tpu.pipeline_mode<synchronous>, transform_indices = @transform_3, window_bounds = array<i64: 8, 32>}]} {
    %c0 = arith.constant 0 : index
    %c0_0 = arith.constant 0 : index
    %0 = vector.load %arg1[%c0, %c0_0] : memref<32x256xbf16, #tpu.memory_space<vmem>>, vector<32x256xbf16>
    %c0_1 = arith.constant 0 : index
    %c0_2 = arith.constant 0 : index
    %1 = vector.load %arg2[%c0_1, %c0_2] : memref<8x32xf32, #tpu.memory_space<vmem>>, vector<8x32xf32>
    %cst = arith.constant 0.000000e+00 : f32
    %2 = vector.broadcast %cst : f32 to vector<8x256xf32>
    %c0_i32 = arith.constant 0 : i32
    %3 = arith.truncf %1 : vector<8x32xf32> to vector<8x32xbf16>
    %cst_3 = arith.constant dense<0.000000e+00> : vector<8x256xf32>
    %4 = tpu.matmul %3, %0, %cst_3 {dimension_numbers = #tpu.dot_dimension_numbers<[1], [0], [0], [1], [0, 0, 1, 1], [], []>} : vector<8x32xbf16>, vector<32x256xbf16>, vector<8x256xf32> -> vector<8x256xf32>
    %cst_4 = arith.constant dense<0xFF800000> : vector<256xf32>
    %5 = vector.multi_reduction <maximumf>, %4, %cst_4 [0] : vector<8x256xf32> to vector<256xf32>
    %6 = vector.shape_cast %5 : vector<256xf32> to vector<1x256xf32>
    %7 = vector.broadcast %6 : vector<1x256xf32> to vector<8x256xf32>
    %8 = arith.subf %4, %7 : vector<8x256xf32>
    %9 = math.exp %8 : vector<8x256xf32>
    %cst_5 = arith.constant dense<0.000000e+00> : vector<256xf32>
    %10 = vector.multi_reduction <add>, %9, %cst_5 [0] : vector<8x256xf32> to vector<256xf32>
    %11 = vector.shape_cast %10 : vector<256xf32> to vector<1x256xf32>
    %12 = tpu.reciprocal %11 {approx = true} : vector<1x256xf32> -> vector<1x256xf32>
    %13 = vector.broadcast %12 : vector<1x256xf32> to vector<8x256xf32>
    %14 = arith.mulf %9, %13 : vector<8x256xf32>
    %cst_6 = arith.constant dense<0xFF800000> : vector<8xf32>
    %15 = vector.multi_reduction <maximumf>, %14, %cst_6 [1] : vector<8x256xf32> to vector<8xf32>
    %16 = vector.shape_cast %15 : vector<8xf32> to vector<8x1xf32>
    %cst_7 = arith.constant 5.000000e-01 : f32
    %17 = vector.broadcast %cst_7 : f32 to vector<8x1xf32>
    %18 = arith.mulf %16, %17 : vector<8x1xf32>
    %cst_8 = arith.constant dense<0x7F800000> : vector<8xf32>
    %19 = vector.multi_reduction <minimumf>, %14, %cst_8 [1] : vector<8x256xf32> to vector<8xf32>
    %20 = vector.shape_cast %19 : vector<8xf32> to vector<8x1xf32>
    %cst_9 = arith.constant 5.000000e-01 : f32
    %21 = vector.broadcast %cst_9 : f32 to vector<8x1xf32>
    %22 = arith.mulf %20, %21 : vector<8x1xf32>
    %23 = arith.addf %18, %22 : vector<8x1xf32>
    %24 = vector.broadcast %23 : vector<8x1xf32> to vector<8x256xf32>
    %25 = arith.cmpf olt, %14, %24 : vector<8x256xf32>
    %cst_10 = arith.constant 0.000000e+00 : f32
    %26 = vector.broadcast %cst_10 : f32 to vector<8x256xf32>
    %27 = arith.select %25, %26, %14 : vector<8x256xi1>, vector<8x256xf32>
    %cst_11 = arith.constant dense<0.000000e+00> : vector<8xf32>
    %28 = vector.multi_reduction <add>, %27, %cst_11 [1] : vector<8x256xf32> to vector<8xf32>
    %29 = vector.shape_cast %28 : vector<8xf32> to vector<8x1xf32>
    %30 = arith.truncf %27 : vector<8x256xf32> to vector<8x256xbf16>
    %cst_12 = arith.constant dense<0.000000e+00> : vector<8x32xf32>
    %31 = tpu.matmul %30, %0, %cst_12 {dimension_numbers = #tpu.dot_dimension_numbers<[1], [1], [0], [0], [0, 0, 1, 0], [], []>} : vector<8x256xbf16>, vector<32x256xbf16>, vector<8x32xf32> -> vector<8x32xf32>
    %32 = tpu.reciprocal %29 {approx = true} : vector<8x1xf32> -> vector<8x1xf32>
    %33 = vector.broadcast %32 : vector<8x1xf32> to vector<8x32xf32>
    %34 = arith.mulf %31, %33 : vector<8x32xf32>
    %c1_i32 = arith.constant 1 : i32
    %35 = arith.truncf %34 : vector<8x32xf32> to vector<8x32xbf16>
    %cst_13 = arith.constant dense<0.000000e+00> : vector<8x256xf32>
    %36 = tpu.matmul %35, %0, %cst_13 {dimension_numbers = #tpu.dot_dimension_numbers<[1], [0], [0], [1], [0, 0, 1, 1], [], []>} : vector<8x32xbf16>, vector<32x256xbf16>, vector<8x256xf32> -> vector<8x256xf32>
    %cst_14 = arith.constant dense<0xFF800000> : vector<256xf32>
    %37 = vector.multi_reduction <maximumf>, %36, %cst_14 [0] : vector<8x256xf32> to vector<256xf32>
    %38 = vector.shape_cast %37 : vector<256xf32> to vector<1x256xf32>
    %39 = vector.broadcast %38 : vector<1x256xf32> to vector<8x256xf32>
    %40 = arith.subf %36, %39 : vector<8x256xf32>
    %41 = math.exp %40 : vector<8x256xf32>
    %cst_15 = arith.constant dense<0.000000e+00> : vector<256xf32>
    %42 = vector.multi_reduction <add>, %41, %cst_15 [0] : vector<8x256xf32> to vector<256xf32>
    %43 = vector.shape_cast %42 : vector<256xf32> to vector<1x256xf32>
    %44 = tpu.reciprocal %43 {approx = true} : vector<1x256xf32> -> vector<1x256xf32>
    %45 = vector.broadcast %44 : vector<1x256xf32> to vector<8x256xf32>
    %46 = arith.mulf %41, %45 : vector<8x256xf32>
    %cst_16 = arith.constant dense<0xFF800000> : vector<8xf32>
    %47 = vector.multi_reduction <maximumf>, %46, %cst_16 [1] : vector<8x256xf32> to vector<8xf32>
    %48 = vector.shape_cast %47 : vector<8xf32> to vector<8x1xf32>
    %cst_17 = arith.constant 5.000000e-01 : f32
    %49 = vector.broadcast %cst_17 : f32 to vector<8x1xf32>
    %50 = arith.mulf %48, %49 : vector<8x1xf32>
    %cst_18 = arith.constant dense<0x7F800000> : vector<8xf32>
    %51 = vector.multi_reduction <minimumf>, %46, %cst_18 [1] : vector<8x256xf32> to vector<8xf32>
    %52 = vector.shape_cast %51 : vector<8xf32> to vector<8x1xf32>
    %cst_19 = arith.constant 5.000000e-01 : f32
    %53 = vector.broadcast %cst_19 : f32 to vector<8x1xf32>
    %54 = arith.mulf %52, %53 : vector<8x1xf32>
    %55 = arith.addf %50, %54 : vector<8x1xf32>
    %56 = vector.broadcast %55 : vector<8x1xf32> to vector<8x256xf32>
    %57 = arith.cmpf olt, %46, %56 : vector<8x256xf32>
    %cst_20 = arith.constant 0.000000e+00 : f32
    %58 = vector.broadcast %cst_20 : f32 to vector<8x256xf32>
    %59 = arith.select %57, %58, %46 : vector<8x256xi1>, vector<8x256xf32>
    %cst_21 = arith.constant dense<0.000000e+00> : vector<8xf32>
    %60 = vector.multi_reduction <add>, %59, %cst_21 [1] : vector<8x256xf32> to vector<8xf32>
    %61 = vector.shape_cast %60 : vector<8xf32> to vector<8x1xf32>
    %62 = arith.truncf %59 : vector<8x256xf32> to vector<8x256xbf16>
    %cst_22 = arith.constant dense<0.000000e+00> : vector<8x32xf32>
    %63 = tpu.matmul %62, %0, %cst_22 {dimension_numbers = #tpu.dot_dimension_numbers<[1], [1], [0], [0], [0, 0, 1, 0], [], []>} : vector<8x256xbf16>, vector<32x256xbf16>, vector<8x32xf32> -> vector<8x32xf32>
    %64 = tpu.reciprocal %61 {approx = true} : vector<8x1xf32> -> vector<8x1xf32>
    %65 = vector.broadcast %64 : vector<8x1xf32> to vector<8x32xf32>
    %66 = arith.mulf %63, %65 : vector<8x32xf32>
    %c2_i32 = arith.constant 2 : i32
    %67 = arith.truncf %66 : vector<8x32xf32> to vector<8x32xbf16>
    %cst_23 = arith.constant dense<0.000000e+00> : vector<8x256xf32>
    %68 = tpu.matmul %67, %0, %cst_23 {dimension_numbers = #tpu.dot_dimension_numbers<[1], [0], [0], [1], [0, 0, 1, 1], [], []>} : vector<8x32xbf16>, vector<32x256xbf16>, vector<8x256xf32> -> vector<8x256xf32>
    %cst_24 = arith.constant dense<0xFF800000> : vector<256xf32>
    %69 = vector.multi_reduction <maximumf>, %68, %cst_24 [0] : vector<8x256xf32> to vector<256xf32>
    %70 = vector.shape_cast %69 : vector<256xf32> to vector<1x256xf32>
    %71 = vector.broadcast %70 : vector<1x256xf32> to vector<8x256xf32>
    %72 = arith.subf %68, %71 : vector<8x256xf32>
    %73 = math.exp %72 : vector<8x256xf32>
    %cst_25 = arith.constant dense<0.000000e+00> : vector<256xf32>
    %74 = vector.multi_reduction <add>, %73, %cst_25 [0] : vector<8x256xf32> to vector<256xf32>
    %75 = vector.shape_cast %74 : vector<256xf32> to vector<1x256xf32>
    %76 = tpu.reciprocal %75 {approx = true} : vector<1x256xf32> -> vector<1x256xf32>
    %77 = vector.broadcast %76 : vector<1x256xf32> to vector<8x256xf32>
    %78 = arith.mulf %73, %77 : vector<8x256xf32>
    %cst_26 = arith.constant dense<0xFF800000> : vector<8xf32>
    %79 = vector.multi_reduction <maximumf>, %78, %cst_26 [1] : vector<8x256xf32> to vector<8xf32>
    %80 = vector.shape_cast %79 : vector<8xf32> to vector<8x1xf32>
    %cst_27 = arith.constant 5.000000e-01 : f32
    %81 = vector.broadcast %cst_27 : f32 to vector<8x1xf32>
    %82 = arith.mulf %80, %81 : vector<8x1xf32>
    %cst_28 = arith.constant dense<0x7F800000> : vector<8xf32>
    %83 = vector.multi_reduction <minimumf>, %78, %cst_28 [1] : vector<8x256xf32> to vector<8xf32>
    %84 = vector.shape_cast %83 : vector<8xf32> to vector<8x1xf32>
    %cst_29 = arith.constant 5.000000e-01 : f32
    %85 = vector.broadcast %cst_29 : f32 to vector<8x1xf32>
    %86 = arith.mulf %84, %85 : vector<8x1xf32>
    %87 = arith.addf %82, %86 : vector<8x1xf32>
    %88 = vector.broadcast %87 : vector<8x1xf32> to vector<8x256xf32>
    %89 = arith.cmpf olt, %78, %88 : vector<8x256xf32>
    %cst_30 = arith.constant 0.000000e+00 : f32
    %90 = vector.broadcast %cst_30 : f32 to vector<8x256xf32>
    %91 = arith.select %89, %90, %78 : vector<8x256xi1>, vector<8x256xf32>
    %cst_31 = arith.constant dense<0.000000e+00> : vector<8xf32>
    %92 = vector.multi_reduction <add>, %91, %cst_31 [1] : vector<8x256xf32> to vector<8xf32>
    %93 = vector.shape_cast %92 : vector<8xf32> to vector<8x1xf32>
    %94 = arith.truncf %91 : vector<8x256xf32> to vector<8x256xbf16>
    %cst_32 = arith.constant dense<0.000000e+00> : vector<8x32xf32>
    %95 = tpu.matmul %94, %0, %cst_32 {dimension_numbers = #tpu.dot_dimension_numbers<[1], [1], [0], [0], [0, 0, 1, 0], [], []>} : vector<8x256xbf16>, vector<32x256xbf16>, vector<8x32xf32> -> vector<8x32xf32>
    %96 = tpu.reciprocal %93 {approx = true} : vector<8x1xf32> -> vector<8x1xf32>
    %97 = vector.broadcast %96 : vector<8x1xf32> to vector<8x32xf32>
    %98 = arith.mulf %95, %97 : vector<8x32xf32>
    %c3_i32 = arith.constant 3 : i32
    %99 = arith.truncf %98 : vector<8x32xf32> to vector<8x32xbf16>
    %cst_33 = arith.constant dense<0.000000e+00> : vector<8x256xf32>
    %100 = tpu.matmul %99, %0, %cst_33 {dimension_numbers = #tpu.dot_dimension_numbers<[1], [0], [0], [1], [0, 0, 1, 1], [], []>} : vector<8x32xbf16>, vector<32x256xbf16>, vector<8x256xf32> -> vector<8x256xf32>
    %cst_34 = arith.constant dense<0xFF800000> : vector<256xf32>
    %101 = vector.multi_reduction <maximumf>, %100, %cst_34 [0] : vector<8x256xf32> to vector<256xf32>
    %102 = vector.shape_cast %101 : vector<256xf32> to vector<1x256xf32>
    %103 = vector.broadcast %102 : vector<1x256xf32> to vector<8x256xf32>
    %104 = arith.subf %100, %103 : vector<8x256xf32>
    %105 = math.exp %104 : vector<8x256xf32>
    %cst_35 = arith.constant dense<0.000000e+00> : vector<256xf32>
    %106 = vector.multi_reduction <add>, %105, %cst_35 [0] : vector<8x256xf32> to vector<256xf32>
    %107 = vector.shape_cast %106 : vector<256xf32> to vector<1x256xf32>
    %108 = tpu.reciprocal %107 {approx = true} : vector<1x256xf32> -> vector<1x256xf32>
    %109 = vector.broadcast %108 : vector<1x256xf32> to vector<8x256xf32>
    %110 = arith.mulf %105, %109 : vector<8x256xf32>
    %cst_36 = arith.constant dense<0xFF800000> : vector<8xf32>
    %111 = vector.multi_reduction <maximumf>, %110, %cst_36 [1] : vector<8x256xf32> to vector<8xf32>
    %112 = vector.shape_cast %111 : vector<8xf32> to vector<8x1xf32>
    %cst_37 = arith.constant 5.000000e-01 : f32
    %113 = vector.broadcast %cst_37 : f32 to vector<8x1xf32>
    %114 = arith.mulf %112, %113 : vector<8x1xf32>
    %cst_38 = arith.constant dense<0x7F800000> : vector<8xf32>
    %115 = vector.multi_reduction <minimumf>, %110, %cst_38 [1] : vector<8x256xf32> to vector<8xf32>
    %116 = vector.shape_cast %115 : vector<8xf32> to vector<8x1xf32>
    %cst_39 = arith.constant 5.000000e-01 : f32
    %117 = vector.broadcast %cst_39 : f32 to vector<8x1xf32>
    %118 = arith.mulf %116, %117 : vector<8x1xf32>
    %119 = arith.addf %114, %118 : vector<8x1xf32>
    %120 = vector.broadcast %119 : vector<8x1xf32> to vector<8x256xf32>
    %121 = arith.cmpf olt, %110, %120 : vector<8x256xf32>
    %cst_40 = arith.constant 0.000000e+00 : f32
    %122 = vector.broadcast %cst_40 : f32 to vector<8x256xf32>
    %123 = arith.select %121, %122, %110 : vector<8x256xi1>, vector<8x256xf32>
    %cst_41 = arith.constant dense<0.000000e+00> : vector<8xf32>
    %124 = vector.multi_reduction <add>, %123, %cst_41 [1] : vector<8x256xf32> to vector<8xf32>
    %125 = vector.shape_cast %124 : vector<8xf32> to vector<8x1xf32>
    %126 = arith.truncf %123 : vector<8x256xf32> to vector<8x256xbf16>
    %cst_42 = arith.constant dense<0.000000e+00> : vector<8x32xf32>
    %127 = tpu.matmul %126, %0, %cst_42 {dimension_numbers = #tpu.dot_dimension_numbers<[1], [1], [0], [0], [0, 0, 1, 0], [], []>} : vector<8x256xbf16>, vector<32x256xbf16>, vector<8x32xf32> -> vector<8x32xf32>
    %128 = tpu.reciprocal %125 {approx = true} : vector<8x1xf32> -> vector<8x1xf32>
    %129 = vector.broadcast %128 : vector<8x1xf32> to vector<8x32xf32>
    %130 = arith.mulf %127, %129 : vector<8x32xf32>
    %c4_i32 = arith.constant 4 : i32
    %131 = arith.truncf %130 : vector<8x32xf32> to vector<8x32xbf16>
    %cst_43 = arith.constant dense<0.000000e+00> : vector<8x256xf32>
    %132 = tpu.matmul %131, %0, %cst_43 {dimension_numbers = #tpu.dot_dimension_numbers<[1], [0], [0], [1], [0, 0, 1, 1], [], []>} : vector<8x32xbf16>, vector<32x256xbf16>, vector<8x256xf32> -> vector<8x256xf32>
    %cst_44 = arith.constant dense<0xFF800000> : vector<256xf32>
    %133 = vector.multi_reduction <maximumf>, %132, %cst_44 [0] : vector<8x256xf32> to vector<256xf32>
    %134 = vector.shape_cast %133 : vector<256xf32> to vector<1x256xf32>
    %135 = vector.broadcast %134 : vector<1x256xf32> to vector<8x256xf32>
    %136 = arith.subf %132, %135 : vector<8x256xf32>
    %137 = math.exp %136 : vector<8x256xf32>
    %cst_45 = arith.constant dense<0.000000e+00> : vector<256xf32>
    %138 = vector.multi_reduction <add>, %137, %cst_45 [0] : vector<8x256xf32> to vector<256xf32>
    %139 = vector.shape_cast %138 : vector<256xf32> to vector<1x256xf32>
    %140 = tpu.reciprocal %139 {approx = true} : vector<1x256xf32> -> vector<1x256xf32>
    %141 = vector.broadcast %140 : vector<1x256xf32> to vector<8x256xf32>
    %142 = arith.mulf %137, %141 : vector<8x256xf32>
    %cst_46 = arith.constant dense<0xFF800000> : vector<8xf32>
    %143 = vector.multi_reduction <maximumf>, %142, %cst_46 [1] : vector<8x256xf32> to vector<8xf32>
    %144 = vector.shape_cast %143 : vector<8xf32> to vector<8x1xf32>
    %cst_47 = arith.constant 5.000000e-01 : f32
    %145 = vector.broadcast %cst_47 : f32 to vector<8x1xf32>
    %146 = arith.mulf %144, %145 : vector<8x1xf32>
    %cst_48 = arith.constant dense<0x7F800000> : vector<8xf32>
    %147 = vector.multi_reduction <minimumf>, %142, %cst_48 [1] : vector<8x256xf32> to vector<8xf32>
    %148 = vector.shape_cast %147 : vector<8xf32> to vector<8x1xf32>
    %cst_49 = arith.constant 5.000000e-01 : f32
    %149 = vector.broadcast %cst_49 : f32 to vector<8x1xf32>
    %150 = arith.mulf %148, %149 : vector<8x1xf32>
    %151 = arith.addf %146, %150 : vector<8x1xf32>
    %152 = vector.broadcast %151 : vector<8x1xf32> to vector<8x256xf32>
    %153 = arith.cmpf olt, %142, %152 : vector<8x256xf32>
    %cst_50 = arith.constant 0.000000e+00 : f32
    %154 = vector.broadcast %cst_50 : f32 to vector<8x256xf32>
    %155 = arith.select %153, %154, %142 : vector<8x256xi1>, vector<8x256xf32>
    %cst_51 = arith.constant dense<0.000000e+00> : vector<8xf32>
    %156 = vector.multi_reduction <add>, %155, %cst_51 [1] : vector<8x256xf32> to vector<8xf32>
    %157 = vector.shape_cast %156 : vector<8xf32> to vector<8x1xf32>
    %158 = arith.truncf %155 : vector<8x256xf32> to vector<8x256xbf16>
    %cst_52 = arith.constant dense<0.000000e+00> : vector<8x32xf32>
    %159 = tpu.matmul %158, %0, %cst_52 {dimension_numbers = #tpu.dot_dimension_numbers<[1], [1], [0], [0], [0, 0, 1, 0], [], []>} : vector<8x256xbf16>, vector<32x256xbf16>, vector<8x32xf32> -> vector<8x32xf32>
    %160 = tpu.reciprocal %157 {approx = true} : vector<8x1xf32> -> vector<8x1xf32>
    %161 = vector.broadcast %160 : vector<8x1xf32> to vector<8x32xf32>
    %162 = arith.mulf %159, %161 : vector<8x32xf32>
    %c5_i32 = arith.constant 5 : i32
    %163 = arith.truncf %162 : vector<8x32xf32> to vector<8x32xbf16>
    %cst_53 = arith.constant dense<0.000000e+00> : vector<8x256xf32>
    %164 = tpu.matmul %163, %0, %cst_53 {dimension_numbers = #tpu.dot_dimension_numbers<[1], [0], [0], [1], [0, 0, 1, 1], [], []>} : vector<8x32xbf16>, vector<32x256xbf16>, vector<8x256xf32> -> vector<8x256xf32>
    %cst_54 = arith.constant dense<0xFF800000> : vector<256xf32>
    %165 = vector.multi_reduction <maximumf>, %164, %cst_54 [0] : vector<8x256xf32> to vector<256xf32>
    %166 = vector.shape_cast %165 : vector<256xf32> to vector<1x256xf32>
    %167 = vector.broadcast %166 : vector<1x256xf32> to vector<8x256xf32>
    %168 = arith.subf %164, %167 : vector<8x256xf32>
    %169 = math.exp %168 : vector<8x256xf32>
    %cst_55 = arith.constant dense<0.000000e+00> : vector<256xf32>
    %170 = vector.multi_reduction <add>, %169, %cst_55 [0] : vector<8x256xf32> to vector<256xf32>
    %171 = vector.shape_cast %170 : vector<256xf32> to vector<1x256xf32>
    %172 = tpu.reciprocal %171 {approx = true} : vector<1x256xf32> -> vector<1x256xf32>
    %173 = vector.broadcast %172 : vector<1x256xf32> to vector<8x256xf32>
    %174 = arith.mulf %169, %173 : vector<8x256xf32>
    %cst_56 = arith.constant dense<0xFF800000> : vector<8xf32>
    %175 = vector.multi_reduction <maximumf>, %174, %cst_56 [1] : vector<8x256xf32> to vector<8xf32>
    %176 = vector.shape_cast %175 : vector<8xf32> to vector<8x1xf32>
    %cst_57 = arith.constant 5.000000e-01 : f32
    %177 = vector.broadcast %cst_57 : f32 to vector<8x1xf32>
    %178 = arith.mulf %176, %177 : vector<8x1xf32>
    %cst_58 = arith.constant dense<0x7F800000> : vector<8xf32>
    %179 = vector.multi_reduction <minimumf>, %174, %cst_58 [1] : vector<8x256xf32> to vector<8xf32>
    %180 = vector.shape_cast %179 : vector<8xf32> to vector<8x1xf32>
    %cst_59 = arith.constant 5.000000e-01 : f32
    %181 = vector.broadcast %cst_59 : f32 to vector<8x1xf32>
    %182 = arith.mulf %180, %181 : vector<8x1xf32>
    %183 = arith.addf %178, %182 : vector<8x1xf32>
    %184 = vector.broadcast %183 : vector<8x1xf32> to vector<8x256xf32>
    %185 = arith.cmpf olt, %174, %184 : vector<8x256xf32>
    %cst_60 = arith.constant 0.000000e+00 : f32
    %186 = vector.broadcast %cst_60 : f32 to vector<8x256xf32>
    %187 = arith.select %185, %186, %174 : vector<8x256xi1>, vector<8x256xf32>
    %cst_61 = arith.constant dense<0.000000e+00> : vector<8xf32>
    %188 = vector.multi_reduction <add>, %187, %cst_61 [1] : vector<8x256xf32> to vector<8xf32>
    %189 = vector.shape_cast %188 : vector<8xf32> to vector<8x1xf32>
    %190 = arith.truncf %187 : vector<8x256xf32> to vector<8x256xbf16>
    %cst_62 = arith.constant dense<0.000000e+00> : vector<8x32xf32>
    %191 = tpu.matmul %190, %0, %cst_62 {dimension_numbers = #tpu.dot_dimension_numbers<[1], [1], [0], [0], [0, 0, 1, 0], [], []>} : vector<8x256xbf16>, vector<32x256xbf16>, vector<8x32xf32> -> vector<8x32xf32>
    %192 = tpu.reciprocal %189 {approx = true} : vector<8x1xf32> -> vector<8x1xf32>
    %193 = vector.broadcast %192 : vector<8x1xf32> to vector<8x32xf32>
    %194 = arith.mulf %191, %193 : vector<8x32xf32>
    %c6_i32 = arith.constant 6 : i32
    %195 = arith.truncf %194 : vector<8x32xf32> to vector<8x32xbf16>
    %cst_63 = arith.constant dense<0.000000e+00> : vector<8x256xf32>
    %196 = tpu.matmul %195, %0, %cst_63 {dimension_numbers = #tpu.dot_dimension_numbers<[1], [0], [0], [1], [0, 0, 1, 1], [], []>} : vector<8x32xbf16>, vector<32x256xbf16>, vector<8x256xf32> -> vector<8x256xf32>
    %cst_64 = arith.constant dense<0xFF800000> : vector<256xf32>
    %197 = vector.multi_reduction <maximumf>, %196, %cst_64 [0] : vector<8x256xf32> to vector<256xf32>
    %198 = vector.shape_cast %197 : vector<256xf32> to vector<1x256xf32>
    %199 = vector.broadcast %198 : vector<1x256xf32> to vector<8x256xf32>
    %200 = arith.subf %196, %199 : vector<8x256xf32>
    %201 = math.exp %200 : vector<8x256xf32>
    %cst_65 = arith.constant dense<0.000000e+00> : vector<256xf32>
    %202 = vector.multi_reduction <add>, %201, %cst_65 [0] : vector<8x256xf32> to vector<256xf32>
    %203 = vector.shape_cast %202 : vector<256xf32> to vector<1x256xf32>
    %204 = tpu.reciprocal %203 {approx = true} : vector<1x256xf32> -> vector<1x256xf32>
    %205 = vector.broadcast %204 : vector<1x256xf32> to vector<8x256xf32>
    %206 = arith.mulf %201, %205 : vector<8x256xf32>
    %cst_66 = arith.constant dense<0xFF800000> : vector<8xf32>
    %207 = vector.multi_reduction <maximumf>, %206, %cst_66 [1] : vector<8x256xf32> to vector<8xf32>
    %208 = vector.shape_cast %207 : vector<8xf32> to vector<8x1xf32>
    %cst_67 = arith.constant 5.000000e-01 : f32
    %209 = vector.broadcast %cst_67 : f32 to vector<8x1xf32>
    %210 = arith.mulf %208, %209 : vector<8x1xf32>
    %cst_68 = arith.constant dense<0x7F800000> : vector<8xf32>
    %211 = vector.multi_reduction <minimumf>, %206, %cst_68 [1] : vector<8x256xf32> to vector<8xf32>
    %212 = vector.shape_cast %211 : vector<8xf32> to vector<8x1xf32>
    %cst_69 = arith.constant 5.000000e-01 : f32
    %213 = vector.broadcast %cst_69 : f32 to vector<8x1xf32>
    %214 = arith.mulf %212, %213 : vector<8x1xf32>
    %215 = arith.addf %210, %214 : vector<8x1xf32>
    %216 = vector.broadcast %215 : vector<8x1xf32> to vector<8x256xf32>
    %217 = arith.cmpf olt, %206, %216 : vector<8x256xf32>
    %cst_70 = arith.constant 0.000000e+00 : f32
    %218 = vector.broadcast %cst_70 : f32 to vector<8x256xf32>
    %219 = arith.select %217, %218, %206 : vector<8x256xi1>, vector<8x256xf32>
    %cst_71 = arith.constant dense<0.000000e+00> : vector<8xf32>
    %220 = vector.multi_reduction <add>, %219, %cst_71 [1] : vector<8x256xf32> to vector<8xf32>
    %221 = vector.shape_cast %220 : vector<8xf32> to vector<8x1xf32>
    %222 = arith.truncf %219 : vector<8x256xf32> to vector<8x256xbf16>
    %cst_72 = arith.constant dense<0.000000e+00> : vector<8x32xf32>
    %223 = tpu.matmul %222, %0, %cst_72 {dimension_numbers = #tpu.dot_dimension_numbers<[1], [1], [0], [0], [0, 0, 1, 0], [], []>} : vector<8x256xbf16>, vector<32x256xbf16>, vector<8x32xf32> -> vector<8x32xf32>
    %224 = tpu.reciprocal %221 {approx = true} : vector<8x1xf32> -> vector<8x1xf32>
    %225 = vector.broadcast %224 : vector<8x1xf32> to vector<8x32xf32>
    %226 = arith.mulf %223, %225 : vector<8x32xf32>
    %c7_i32 = arith.constant 7 : i32
    %227 = arith.truncf %226 : vector<8x32xf32> to vector<8x32xbf16>
    %cst_73 = arith.constant dense<0.000000e+00> : vector<8x256xf32>
    %228 = tpu.matmul %227, %0, %cst_73 {dimension_numbers = #tpu.dot_dimension_numbers<[1], [0], [0], [1], [0, 0, 1, 1], [], []>} : vector<8x32xbf16>, vector<32x256xbf16>, vector<8x256xf32> -> vector<8x256xf32>
    %cst_74 = arith.constant dense<0xFF800000> : vector<256xf32>
    %229 = vector.multi_reduction <maximumf>, %228, %cst_74 [0] : vector<8x256xf32> to vector<256xf32>
    %230 = vector.shape_cast %229 : vector<256xf32> to vector<1x256xf32>
    %231 = vector.broadcast %230 : vector<1x256xf32> to vector<8x256xf32>
    %232 = arith.subf %228, %231 : vector<8x256xf32>
    %233 = math.exp %232 : vector<8x256xf32>
    %cst_75 = arith.constant dense<0.000000e+00> : vector<256xf32>
    %234 = vector.multi_reduction <add>, %233, %cst_75 [0] : vector<8x256xf32> to vector<256xf32>
    %235 = vector.shape_cast %234 : vector<256xf32> to vector<1x256xf32>
    %236 = tpu.reciprocal %235 {approx = true} : vector<1x256xf32> -> vector<1x256xf32>
    %237 = vector.broadcast %236 : vector<1x256xf32> to vector<8x256xf32>
    %238 = arith.mulf %233, %237 : vector<8x256xf32>
    %cst_76 = arith.constant dense<0xFF800000> : vector<8xf32>
    %239 = vector.multi_reduction <maximumf>, %238, %cst_76 [1] : vector<8x256xf32> to vector<8xf32>
    %240 = vector.shape_cast %239 : vector<8xf32> to vector<8x1xf32>
    %cst_77 = arith.constant 5.000000e-01 : f32
    %241 = vector.broadcast %cst_77 : f32 to vector<8x1xf32>
    %242 = arith.mulf %240, %241 : vector<8x1xf32>
    %cst_78 = arith.constant dense<0x7F800000> : vector<8xf32>
    %243 = vector.multi_reduction <minimumf>, %238, %cst_78 [1] : vector<8x256xf32> to vector<8xf32>
    %244 = vector.shape_cast %243 : vector<8xf32> to vector<8x1xf32>
    %cst_79 = arith.constant 5.000000e-01 : f32
    %245 = vector.broadcast %cst_79 : f32 to vector<8x1xf32>
    %246 = arith.mulf %244, %245 : vector<8x1xf32>
    %247 = arith.addf %242, %246 : vector<8x1xf32>
    %248 = vector.broadcast %247 : vector<8x1xf32> to vector<8x256xf32>
    %249 = arith.cmpf olt, %238, %248 : vector<8x256xf32>
    %cst_80 = arith.constant 0.000000e+00 : f32
    %250 = vector.broadcast %cst_80 : f32 to vector<8x256xf32>
    %251 = arith.select %249, %250, %238 : vector<8x256xi1>, vector<8x256xf32>
    %cst_81 = arith.constant dense<0.000000e+00> : vector<8xf32>
    %252 = vector.multi_reduction <add>, %251, %cst_81 [1] : vector<8x256xf32> to vector<8xf32>
    %253 = vector.shape_cast %252 : vector<8xf32> to vector<8x1xf32>
    %254 = arith.truncf %251 : vector<8x256xf32> to vector<8x256xbf16>
    %cst_82 = arith.constant dense<0.000000e+00> : vector<8x32xf32>
    %255 = tpu.matmul %254, %0, %cst_82 {dimension_numbers = #tpu.dot_dimension_numbers<[1], [1], [0], [0], [0, 0, 1, 0], [], []>} : vector<8x256xbf16>, vector<32x256xbf16>, vector<8x32xf32> -> vector<8x32xf32>
    %256 = tpu.reciprocal %253 {approx = true} : vector<8x1xf32> -> vector<8x1xf32>
    %257 = vector.broadcast %256 : vector<8x1xf32> to vector<8x32xf32>
    %258 = arith.mulf %255, %257 : vector<8x32xf32>
    %c8_i32 = arith.constant 8 : i32
    %259 = arith.truncf %258 : vector<8x32xf32> to vector<8x32xbf16>
    %cst_83 = arith.constant dense<0.000000e+00> : vector<8x256xf32>
    %260 = tpu.matmul %259, %0, %cst_83 {dimension_numbers = #tpu.dot_dimension_numbers<[1], [0], [0], [1], [0, 0, 1, 1], [], []>} : vector<8x32xbf16>, vector<32x256xbf16>, vector<8x256xf32> -> vector<8x256xf32>
    %cst_84 = arith.constant dense<0xFF800000> : vector<256xf32>
    %261 = vector.multi_reduction <maximumf>, %260, %cst_84 [0] : vector<8x256xf32> to vector<256xf32>
    %262 = vector.shape_cast %261 : vector<256xf32> to vector<1x256xf32>
    %263 = vector.broadcast %262 : vector<1x256xf32> to vector<8x256xf32>
    %264 = arith.subf %260, %263 : vector<8x256xf32>
    %265 = math.exp %264 : vector<8x256xf32>
    %cst_85 = arith.constant dense<0.000000e+00> : vector<256xf32>
    %266 = vector.multi_reduction <add>, %265, %cst_85 [0] : vector<8x256xf32> to vector<256xf32>
    %267 = vector.shape_cast %266 : vector<256xf32> to vector<1x256xf32>
    %268 = tpu.reciprocal %267 {approx = true} : vector<1x256xf32> -> vector<1x256xf32>
    %269 = vector.broadcast %268 : vector<1x256xf32> to vector<8x256xf32>
    %270 = arith.mulf %265, %269 : vector<8x256xf32>
    %cst_86 = arith.constant dense<0xFF800000> : vector<8xf32>
    %271 = vector.multi_reduction <maximumf>, %270, %cst_86 [1] : vector<8x256xf32> to vector<8xf32>
    %272 = vector.shape_cast %271 : vector<8xf32> to vector<8x1xf32>
    %cst_87 = arith.constant 5.000000e-01 : f32
    %273 = vector.broadcast %cst_87 : f32 to vector<8x1xf32>
    %274 = arith.mulf %272, %273 : vector<8x1xf32>
    %cst_88 = arith.constant dense<0x7F800000> : vector<8xf32>
    %275 = vector.multi_reduction <minimumf>, %270, %cst_88 [1] : vector<8x256xf32> to vector<8xf32>
    %276 = vector.shape_cast %275 : vector<8xf32> to vector<8x1xf32>
    %cst_89 = arith.constant 5.000000e-01 : f32
    %277 = vector.broadcast %cst_89 : f32 to vector<8x1xf32>
    %278 = arith.mulf %276, %277 : vector<8x1xf32>
    %279 = arith.addf %274, %278 : vector<8x1xf32>
    %280 = vector.broadcast %279 : vector<8x1xf32> to vector<8x256xf32>
    %281 = arith.cmpf olt, %270, %280 : vector<8x256xf32>
    %cst_90 = arith.constant 0.000000e+00 : f32
    %282 = vector.broadcast %cst_90 : f32 to vector<8x256xf32>
    %283 = arith.select %281, %282, %270 : vector<8x256xi1>, vector<8x256xf32>
    %cst_91 = arith.constant dense<0.000000e+00> : vector<8xf32>
    %284 = vector.multi_reduction <add>, %283, %cst_91 [1] : vector<8x256xf32> to vector<8xf32>
    %285 = vector.shape_cast %284 : vector<8xf32> to vector<8x1xf32>
    %286 = arith.truncf %283 : vector<8x256xf32> to vector<8x256xbf16>
    %cst_92 = arith.constant dense<0.000000e+00> : vector<8x32xf32>
    %287 = tpu.matmul %286, %0, %cst_92 {dimension_numbers = #tpu.dot_dimension_numbers<[1], [1], [0], [0], [0, 0, 1, 0], [], []>} : vector<8x256xbf16>, vector<32x256xbf16>, vector<8x32xf32> -> vector<8x32xf32>
    %288 = tpu.reciprocal %285 {approx = true} : vector<8x1xf32> -> vector<8x1xf32>
    %289 = vector.broadcast %288 : vector<8x1xf32> to vector<8x32xf32>
    %290 = arith.mulf %287, %289 : vector<8x32xf32>
    %c9_i32 = arith.constant 9 : i32
    %291 = arith.truncf %290 : vector<8x32xf32> to vector<8x32xbf16>
    %cst_93 = arith.constant dense<0.000000e+00> : vector<8x256xf32>
    %292 = tpu.matmul %291, %0, %cst_93 {dimension_numbers = #tpu.dot_dimension_numbers<[1], [0], [0], [1], [0, 0, 1, 1], [], []>} : vector<8x32xbf16>, vector<32x256xbf16>, vector<8x256xf32> -> vector<8x256xf32>
    %cst_94 = arith.constant dense<0xFF800000> : vector<256xf32>
    %293 = vector.multi_reduction <maximumf>, %292, %cst_94 [0] : vector<8x256xf32> to vector<256xf32>
    %294 = vector.shape_cast %293 : vector<256xf32> to vector<1x256xf32>
    %295 = vector.broadcast %294 : vector<1x256xf32> to vector<8x256xf32>
    %296 = arith.subf %292, %295 : vector<8x256xf32>
    %297 = math.exp %296 : vector<8x256xf32>
    %cst_95 = arith.constant dense<0.000000e+00> : vector<256xf32>
    %298 = vector.multi_reduction <add>, %297, %cst_95 [0] : vector<8x256xf32> to vector<256xf32>
    %299 = vector.shape_cast %298 : vector<256xf32> to vector<1x256xf32>
    %300 = tpu.reciprocal %299 {approx = true} : vector<1x256xf32> -> vector<1x256xf32>
    %301 = vector.broadcast %300 : vector<1x256xf32> to vector<8x256xf32>
    %302 = arith.mulf %297, %301 : vector<8x256xf32>
    %cst_96 = arith.constant dense<0xFF800000> : vector<8xf32>
    %303 = vector.multi_reduction <maximumf>, %302, %cst_96 [1] : vector<8x256xf32> to vector<8xf32>
    %304 = vector.shape_cast %303 : vector<8xf32> to vector<8x1xf32>
    %cst_97 = arith.constant 5.000000e-01 : f32
    %305 = vector.broadcast %cst_97 : f32 to vector<8x1xf32>
    %306 = arith.mulf %304, %305 : vector<8x1xf32>
    %cst_98 = arith.constant dense<0x7F800000> : vector<8xf32>
    %307 = vector.multi_reduction <minimumf>, %302, %cst_98 [1] : vector<8x256xf32> to vector<8xf32>
    %308 = vector.shape_cast %307 : vector<8xf32> to vector<8x1xf32>
    %cst_99 = arith.constant 5.000000e-01 : f32
    %309 = vector.broadcast %cst_99 : f32 to vector<8x1xf32>
    %310 = arith.mulf %308, %309 : vector<8x1xf32>
    %311 = arith.addf %306, %310 : vector<8x1xf32>
    %312 = vector.broadcast %311 : vector<8x1xf32> to vector<8x256xf32>
    %313 = arith.cmpf olt, %302, %312 : vector<8x256xf32>
    %cst_100 = arith.constant 0.000000e+00 : f32
    %314 = vector.broadcast %cst_100 : f32 to vector<8x256xf32>
    %315 = arith.select %313, %314, %302 : vector<8x256xi1>, vector<8x256xf32>
    %cst_101 = arith.constant dense<0.000000e+00> : vector<8xf32>
    %316 = vector.multi_reduction <add>, %315, %cst_101 [1] : vector<8x256xf32> to vector<8xf32>
    %317 = vector.shape_cast %316 : vector<8xf32> to vector<8x1xf32>
    %318 = arith.truncf %315 : vector<8x256xf32> to vector<8x256xbf16>
    %cst_102 = arith.constant dense<0.000000e+00> : vector<8x32xf32>
    %319 = tpu.matmul %318, %0, %cst_102 {dimension_numbers = #tpu.dot_dimension_numbers<[1], [1], [0], [0], [0, 0, 1, 0], [], []>} : vector<8x256xbf16>, vector<32x256xbf16>, vector<8x32xf32> -> vector<8x32xf32>
    %320 = tpu.reciprocal %317 {approx = true} : vector<8x1xf32> -> vector<8x1xf32>
    %321 = vector.broadcast %320 : vector<8x1xf32> to vector<8x32xf32>
    %322 = arith.mulf %319, %321 : vector<8x32xf32>
    %cst_103 = arith.constant dense<0xFF800000> : vector<256xf32>
    %323 = vector.multi_reduction <maximumf>, %302, %cst_103 [0] : vector<8x256xf32> to vector<256xf32>
    %324 = vector.shape_cast %323 : vector<256xf32> to vector<1x256xf32>
    %325 = tpu.iota {dimensions = array<i32: 0>} : vector<8x256xi32>
    %326 = vector.broadcast %324 : vector<1x256xf32> to vector<8x256xf32>
    %327 = arith.cmpf oeq, %302, %326 : vector<8x256xf32>
    %c8_i32_104 = arith.constant 8 : i32
    %328 = vector.broadcast %c8_i32_104 : i32 to vector<8x256xi32>
    %329 = arith.select %327, %325, %328 : vector<8x256xi1>, vector<8x256xi32>
    %cst_105 = arith.constant dense<2147483647> : vector<256xi32>
    %330 = vector.multi_reduction <minsi>, %329, %cst_105 [0] : vector<8x256xi32> to vector<256xi32>
    %331 = vector.shape_cast %330 : vector<256xi32> to vector<1x256xi32>
    %c0_106 = arith.constant 0 : index
    %c0_107 = arith.constant 0 : index
    %332 = vector.load %arg3[%c0_106, %c0_107] : memref<1x256xi32, #tpu.memory_space<vmem>>, vector<1x256xi32>
    tpu.vector_store %arg3[%c0_106, %c0_107], %331 {strides = array<i32>} : memref<1x256xi32, #tpu.memory_space<vmem>>, vector<1x256xi32>,
    %c0_108 = arith.constant 0 : index
    %c0_109 = arith.constant 0 : index
    %333 = vector.load %arg4[%c0_108, %c0_109] : memref<8x32xf32, #tpu.memory_space<vmem>>, vector<8x32xf32>
    tpu.vector_store %arg4[%c0_108, %c0_109], %322 {strides = array<i32>} : memref<8x32xf32, #tpu.memory_space<vmem>>, vector<8x32xf32>,
    return
  }
  func.func @transform_0(%arg0: i32) -> (i32, i32) {
    %c0_i32 = arith.constant 0 : i32
    %c0_i32_0 = arith.constant 0 : i32
    %c0_i32_1 = arith.constant 0 : i32
    return %c0_i32, %c0_i32_0 : i32, i32
  }
  func.func @transform_1(%arg0: i32) -> (i32, i32) {
    %c0_i32 = arith.constant 0 : i32
    %c0_i32_0 = arith.constant 0 : i32
    %c0_i32_1 = arith.constant 0 : i32
    return %c0_i32, %c0_i32_0 : i32, i32
  }
  func.func @transform_2(%arg0: i32) -> (i32, i32) {
    %c0_i32 = arith.constant 0 : i32
    %c0_i32_0 = arith.constant 0 : i32
    %c0_i32_1 = arith.constant 0 : i32
    return %c0_i32, %c0_i32_0 : i32, i32
  }
  func.func @transform_3(%arg0: i32) -> (i32, i32) {
    %c0_i32 = arith.constant 0 : i32
    %c0_i32_0 = arith.constant 0 : i32
    %c0_i32_1 = arith.constant 0 : i32
    return %c0_i32, %c0_i32_0 : i32, i32
  }
}

</mosaic_0001>

<bundles_post_ra>
// kernel: tpu_custom_call.1
= control target key start
LH: loop header
LB: loop body
LE: loop exit
PB: predicated region body
PF: predicated region fallthrough
CT: control target
= control target key end

     0   :  { %9 = vsyncpa [#allocation3], 0  ;;  %s1759_s0 = inlined_call_operand.hbm [shape: bf16[32,256], index: 0, kind: input, shape index: {}]   ;;  %s1760_s1 = inlined_call_operand.hbm [shape: f32[8,32], index: 1, kind: input, shape index: {}]   ;;  %s1761_s2 = inlined_call_operand.hbm [shape: s32[1,256], index: 2, kind: output, shape index: {0}]   ;;  %s1762_s3 = inlined_call_operand.hbm [shape: f32[8,32], index: 3, kind: output, shape index: {1}]  }
   0x1   :  { %10 = vsyncpa [#allocation6], 0 }
   0x2   :  { %11 = vsyncpa [#allocation4], 0 }
   0x3   :  { %12 = vsyncpa [#allocation9], 0  ;;  %s17_s14 = sshll.u32 %s1759_s0, 4  ;;  %s1601_s15 = smov [#allocation2]   ;;  %s18_s14 = int_to_ptr.hbm [resolvable:$true] %s17_s14 }
   0x4   :  { %s19_s16 = sshll.u32 %s1601_s15, 4  ;;  %s31_s19 = sshll.u32 %s1760_s1, 4  ;;  %s20_s16 = int_to_ptr.vmem [resolvable:$true] %s19_s16  ;;  %s32_s19 = int_to_ptr.hbm [resolvable:$true] %s31_s19 }
   0x5   :  { %s1602_s20 = smov 128   ;;  %s1603_s21 = smov 8  }
   0x6   :  { %25 = dma.hbm_to_vmem [thread:$0]  %s18_s14, 512, %s20_s16, [#allocation3], %s1602_s20, %s1602_s20, %s1603_s21  }
   0x7   :  { %s1604_s22 = smov [#allocation5]  }
   0x8   :  { %s33_s23 = sshll.u32 %s1604_s22, 4  ;;  %s34_s23 = int_to_ptr.vmem [resolvable:$true] %s33_s23 }
   0x9   :  { %36 = dma.hbm_to_vmem [thread:$0]  %s32_s19, 128, %s34_s23, [#allocation6]  }
   0xa   :  { %1593 = dma.done.wait [#allocation3], 512  }
   0xb   :  { %1594 = vsyncadd [#allocation3], 4294966784 }
   0xc   :  { %1595 = dma.done.wait [#allocation6], 128  }
   0xd   :  { %1596 = vsyncadd [#allocation6], 4294967168  ;;  %v1261_v0 = vld [vmem:[#allocation2 + $0x10] sm:$0xf]  ;;  %v1390_v1 = vld [vmem:[#allocation2 + $0x14] sm:$0xf0] }
   0xe   :  { %v1389_v2 = vld [vmem:[#allocation2 + $0x14] sm:$0xf]  ;;  %v1633_v3 = vor.u32 %v1390_v1, %v1261_v0  ;;  %v1263_v4 = vld [vmem:[#allocation2 + $0x18] sm:$0xf0]  ;;  %v1253_v5 = vld [vmem:[#allocation2] sm:$0xf] }
   0xf   :  { %v1388_v6 = vld [vmem:[#allocation2 + $0x4] sm:$0xf0]  ;;  %v1635_v7 = vor.u32 %v1389_v2, %v1263_v4  ;;  %v1387_v8 = vld [vmem:[#allocation2 + $0x4] sm:$0xf]  ;;  %v1255_v9 = vld [vmem:[#allocation2 + $0x8] sm:$0xf0] }
  0x10   :  { %82 = vmatpush.bf16.msra.mxu0 %v1633_v3  ;;  %v1638_v10 = vor.u32 %v1388_v6, %v1253_v5  ;;  %v50_v11 = vld [vmem:[#allocation5] sm:$0xff]  ;;  %160 = vmatpush.bf16.xpose.msra.mxu2 %v1633_v3  ;;  %v1642_v12 = vor.u32 %v1387_v8, %v1255_v9  ;;  %vm72_vm0 = vcmask 261120   ;;  %s1605_s0 = smov [#allocation7]   ;;  %s1224_s26 = sshll.u32 %s1761_s2, 4  ;;  %s1225_s26 = int_to_ptr.hbm [resolvable:$true] %s1224_s26 }
  0x11   :  { %95 = vmatpush.bf16.msra.mxu1 %v1635_v7  ;;  %173 = vmatpush.bf16.xpose.msra.mxu3 %v1635_v7  ;;  %v51_v13 = vpack.c.bf16 %v50_v11, %v50_v11  ;;  %s1222_s1 = sshll.u32 %s1605_s0, 4  ;;  %s1606_s27 = smov [#allocation8]   ;;  %s1223_s1 = int_to_ptr.vmem [resolvable:$true] %s1222_s1 }
  0x12   :  { %s1233_s28 = sshll.u32 %s1606_s27, 4  ;;  %s1235_s4 = sshll.u32 %s1762_s3, 4  ;;  %s1234_s28 = int_to_ptr.vmem [resolvable:$true] %s1233_s28  ;;  %s1236_s4 = int_to_ptr.hbm [resolvable:$true] %s1235_s4 }
  0x14   :  { %83 = vmatpush.bf16.msra.mxu0 %v1638_v10 }
  0x15   :  { %96 = vmatpush.bf16.msra.mxu1 %v1642_v12 }
  0x17   :  { %1267 = vmatmul.msk.bf16.vlgmr.msra.gmra.mxu0 %vm72_vm0, %v51_v13 }
  0x18   :  { %192 = vmatpush.bf16.msrb.mxu0 %v1633_v3  ;;  %1268 = vmatmul.msk.bf16.vlgmr.msra.gmra.mxu1 %vm72_vm0, %v51_v13 }
  0x19   :  { %205 = vmatpush.bf16.msrb.mxu1 %v1635_v7  ;;  %161 = vmatpush.bf16.xpose.msra.mxu2 %v1638_v10 }
  0x1a   :  { %174 = vmatpush.bf16.xpose.msra.mxu3 %v1642_v12 }
  0x1c   :  { %193 = vmatpush.bf16.msrb.mxu0 %v1638_v10 }
  0x1d   :  { %206 = vmatpush.bf16.msrb.mxu1 %v1642_v12 }
  0x20   :  { %302 = vmatpush.bf16.msra.mxu0 %v1633_v3 }
  0x21   :  { %270 = vmatpush.bf16.xpose.msrb.mxu2 %v1633_v3  ;;  %315 = vmatpush.bf16.msra.mxu1 %v1635_v7 }
  0x22   :  { %283 = vmatpush.bf16.xpose.msrb.mxu3 %v1635_v7 }
  0x24   :  { %303 = vmatpush.bf16.msra.mxu0 %v1638_v10 }
  0x25   :  { %316 = vmatpush.bf16.msra.mxu1 %v1642_v12 }
  0x29   :  { %271 = vmatpush.bf16.xpose.msrb.mxu2 %v1638_v10 }
  0x2a   :  { %284 = vmatpush.bf16.xpose.msrb.mxu3 %v1642_v12 }
  0x94   :  { %v85_v14 = vpop.f32.mrf.mxu0 }
  0x95   :  { %v102_v15 = vrot.slane %v85_v14, 4  ;;  %v98_v16 = vpop.f32.mrf.mxu1 }
  0x96   :  { %v108_v17 = vrot.slane %v98_v16, 4 }
  0x97   :  { %v103_v18 = vmax.f32 %v85_v14, %v102_v15 }
  0x98   :  { %v109_v19 = vmax.f32 %v98_v16, %v108_v17 }
  0x99   :  { %v104_v20 = vrot.slane %v103_v18, 2 }
  0x9a   :  { %v110_v21 = vrot.slane %v109_v19, 2 }
  0x9b   :  { %v105_v22 = vmax.f32 %v103_v18, %v104_v20 }
  0x9c   :  { %v111_v23 = vmax.f32 %v109_v19, %v110_v21  ;;  %v87_v24 = vpop.f32.mrf.mxu0 }
  0x9d   :  { %v106_v25 = vrot.slane %v105_v22, 1  ;;  %v100_v26 = vpop.f32.mrf.mxu1 }
  0x9e   :  { %v112_v27 = vrot.slane %v111_v23, 1 }
  0x9f   :  { %v107_v28 = vmax.f32 %v105_v22, %v106_v25 }
  0xa0   :  { %v113_v29 = vmax.f32 %v111_v23, %v112_v27 }
  0xa1   :  { %v114_v30 = vsub.f32 %v85_v14, %v107_v28 }
  0xa2   :  { %v115_v31 = vsub.f32 %v98_v16, %v113_v29 }
  0xa3   :  { %v116_v32 = vmul.f32 1.442695, %v114_v30 }
  0xa4   :  { %v118_v33 = vmul.f32 1.442695, %v115_v31 }
  0xa5   :  { %1397 = vpow2.f32 %v116_v32 }
  0xa6   :  { %1399 = vpow2.f32 %v118_v33 }
  0xab   :  { %v1398_v34 = vpop.eup %1397 }
  0xac   :  { %v1400_v35 = vpop.eup %1399  ;;  %v120_v36 = vrot.slane %v1398_v34, 4 }
  0xad   :  { %v126_v37 = vrot.slane %v1400_v35, 4 }
  0xae   :  { %v121_v38 = vadd.f32 %v1398_v34, %v120_v36 }
  0xaf   :  { %v127_v39 = vadd.f32 %v1400_v35, %v126_v37 }
  0xb0   :  { %v122_v40 = vrot.slane %v121_v38, 2 }
  0xb1   :  { %v128_v41 = vrot.slane %v127_v39, 2 }
  0xb2   :  { %v123_v42 = vadd.f32 %v122_v40, %v121_v38 }
  0xb3   :  { %v129_v43 = vadd.f32 %v128_v41, %v127_v39 }
  0xb4   :  { %v124_v44 = vrot.slane %v123_v42, 1 }
  0xb5   :  { %v130_v45 = vrot.slane %v129_v43, 1 }
  0xb6   :  { %v125_v46 = vadd.f32 %v124_v44, %v123_v42 }
  0xb7   :  { %v131_v47 = vadd.f32 %v130_v45, %v129_v43 }
  0xb8   :  { %1401 = vrcp.f32 %v125_v46 }
  0xb9   :  { %1403 = vrcp.f32 %v131_v47 }
  0xbe   :  { %v1402_v48 = vpop.eup %1401 }
  0xbf   :  { %v1404_v49 = vpop.eup %1403  ;;  %v134_v50 = vmul.f32 %v1402_v48, %v1398_v34 }
  0xc0   :  { %v135_v51 = vmul.f32 %v1404_v49, %v1400_v35 }
  0xc1   :  { %v1272_v59 = vpack.c.bf16 %v134_v50, %v134_v50 }
  0xc2   :  { %v136_v52 = vmax.f32 %v134_v50, %v135_v51  ;;  %v140_v53 = vmin.f32 %v134_v50, %v135_v51  ;;  %v1277_v63 = vpack.c.bf16 %v135_v51, %v135_v51 }
  0xc4   :  { %137 = vmax.xlane.f32.xlu0 %v136_v52 }
  0xcc   :  { %141 = vmin.xlane.f32.xlu0 %v140_v53 }
 0x137   :  { %v138_v54 = vpop.xlane.xlu0 %137 }
 0x138   :  { %v139_v56 = vmul.f32 0.5, %v138_v54 }
 0x13f   :  { %v142_v55 = vpop.xlane.xlu0 %141 }
 0x140   :  { %v143_v57 = vmul.f32 0.5, %v142_v55 }
 0x142   :  { %v144_v58 = vadd.f32 %v143_v57, %v139_v56 }
 0x144   :  { %vm145_vm1 = vcmp.lt.f32.partialorder %v134_v50, %v144_v58  ;;  %vm146_vm2 = vcmp.lt.f32.partialorder %v135_v51, %v144_v58 }
 0x145   :  { %vm1269_vm3 = vmneg %vm145_vm1  ;;  %v147_v60 = vsel %vm145_vm1, 0.0, %v134_v50  ;;  %v148_v61 = vsel %vm146_vm2, 0.0, %v135_v51 }
 0x146   :  { %vm1271_vm4 = vmpackc.low %vm1269_vm3, %vm1269_vm3  ;;  %v149_v62 = vadd.f32 %v148_v61, %v147_v60 }
 0x147   :  { %1273 = vmatmul.msk.bf16.vlgmr.msra.gmra.mxu2 %vm1271_vm4, %v1272_v59  ;;  %vm1274_vm5 = vmneg %vm146_vm2 }
 0x148   :  { %vm1276_vm6 = vmpackc.low %vm1274_vm5, %vm1274_vm5  ;;  %150 = vadd.xlane.f32.xlu1 %v149_v62  ;;  %380 = vmatpush.bf16.xpose.msra.mxu2 %v1633_v3 }
 0x149   :  { %1278 = vmatmul.msk.bf16.vlgmr.msra.gmra.mxu3 %vm1276_vm6, %v1277_v63 }
 0x14a   :  { %393 = vmatpush.bf16.xpose.msra.mxu3 %v1635_v7 }
 0x150   :  { %381 = vmatpush.bf16.xpose.msra.mxu2 %v1638_v10 }
 0x152   :  { %394 = vmatpush.bf16.xpose.msra.mxu3 %v1642_v12 }
 0x1bb   :  { %v151_v0 = vpop.xlane.xlu1 %150 }
 0x1bc   :  { %1405 = vrcp.f32 %v151_v0 }
 0x1c2   :  { %v1406_v5 = vpop.eup %1405 }
 0x1ca   :  { %v163_v1 = vpop.f32.mrf.mxu2 }
 0x1cc   :  { %v176_v2 = vpop.f32.mrf.mxu3 }
 0x1cd   :  { %v177_v4 = vadd.f32 %v176_v2, %v163_v1 }
 0x1cf   :  { %v181_v6 = vmul.f32 %v1406_v5, %v177_v4 }
 0x1d1   :  { %v182_v8 = vpack.c.bf16 %v181_v6, %v181_v6 }
 0x1d2   :  { %v165_v9 = vpop.f32.mrf.mxu2 }
 0x1d3   :  { %1279 = vmatmul.msk.bf16.vlgmr.msrb.gmra.mxu0 %vm72_vm0, %v182_v8  ;;  %1280 = vmatmul.msk.bf16.vlgmr.msrb.gmra.mxu1 %vm72_vm0, %v182_v8 }
 0x1d4   :  { %v178_v11 = vpop.f32.mrf.mxu3  ;;  %412 = vmatpush.bf16.msrb.mxu0 %v1633_v3  ;;  %425 = vmatpush.bf16.msrb.mxu1 %v1635_v7 }
 0x1d8   :  { %413 = vmatpush.bf16.msrb.mxu0 %v1638_v10  ;;  %426 = vmatpush.bf16.msrb.mxu1 %v1642_v12 }
 0x250   :  { %v195_v13 = vpop.f32.mrf.mxu0  ;;  %v208_v14 = vpop.f32.mrf.mxu1 }
 0x251   :  { %v212_v15 = vrot.slane %v195_v13, 4  ;;  %v218_v16 = vrot.slane %v208_v14, 4 }
 0x253   :  { %v213_v17 = vmax.f32 %v195_v13, %v212_v15  ;;  %v219_v18 = vmax.f32 %v208_v14, %v218_v16 }
 0x255   :  { %v214_v19 = vrot.slane %v213_v17, 2  ;;  %v220_v20 = vrot.slane %v219_v18, 2 }
 0x257   :  { %v215_v21 = vmax.f32 %v213_v17, %v214_v19  ;;  %v221_v22 = vmax.f32 %v219_v18, %v220_v20 }
 0x258   :  { %v197_v23 = vpop.f32.mrf.mxu0  ;;  %v210_v24 = vpop.f32.mrf.mxu1 }
 0x259   :  { %v216_v25 = vrot.slane %v215_v21, 1  ;;  %v222_v26 = vrot.slane %v221_v22, 1 }
 0x25b   :  { %v217_v27 = vmax.f32 %v215_v21, %v216_v25  ;;  %v223_v28 = vmax.f32 %v221_v22, %v222_v26 }
 0x25d   :  { %v224_v29 = vsub.f32 %v195_v13, %v217_v27  ;;  %v225_v30 = vsub.f32 %v208_v14, %v223_v28 }
 0x25f   :  { %v226_v31 = vmul.f32 1.442695, %v224_v29  ;;  %v228_v32 = vmul.f32 1.442695, %v225_v30 }
 0x261   :  { %1407 = vpow2.f32 %v226_v31 }
 0x262   :  { %1409 = vpow2.f32 %v228_v32 }
 0x267   :  { %v1408_v33 = vpop.eup %1407 }
 0x268   :  { %v1410_v34 = vpop.eup %1409  ;;  %v230_v35 = vrot.slane %v1408_v33, 4 }
 0x269   :  { %v236_v36 = vrot.slane %v1410_v34, 4 }
 0x26a   :  { %v231_v37 = vadd.f32 %v1408_v33, %v230_v35 }
 0x26b   :  { %v237_v38 = vadd.f32 %v1410_v34, %v236_v36 }
 0x26c   :  { %v232_v39 = vrot.slane %v231_v37, 2 }
 0x26d   :  { %v238_v40 = vrot.slane %v237_v38, 2 }
 0x26e   :  { %v233_v41 = vadd.f32 %v232_v39, %v231_v37 }
 0x26f   :  { %v239_v42 = vadd.f32 %v238_v40, %v237_v38 }
 0x270   :  { %v234_v43 = vrot.slane %v233_v41, 1 }
 0x271   :  { %v240_v44 = vrot.slane %v239_v42, 1 }
 0x272   :  { %v235_v45 = vadd.f32 %v234_v43, %v233_v41 }
 0x273   :  { %v241_v46 = vadd.f32 %v240_v44, %v239_v42 }
 0x274   :  { %1411 = vrcp.f32 %v235_v45 }
 0x275   :  { %1413 = vrcp.f32 %v241_v46 }
 0x27a   :  { %v1412_v47 = vpop.eup %1411 }
 0x27b   :  { %v1414_v48 = vpop.eup %1413  ;;  %v244_v49 = vmul.f32 %v1412_v47, %v1408_v33 }
 0x27c   :  { %v245_v50 = vmul.f32 %v1414_v48, %v1410_v34 }
 0x27d   :  { %v1284_v58 = vpack.c.bf16 %v244_v49, %v244_v49 }
 0x27e   :  { %v250_v51 = vmin.f32 %v244_v49, %v245_v50  ;;  %v246_v52 = vmax.f32 %v244_v49, %v245_v50  ;;  %v1289_v62 = vpack.c.bf16 %v245_v50, %v245_v50 }
 0x280   :  { %251 = vmin.xlane.f32.xlu2 %v250_v51  ;;  %247 = vmax.xlane.f32.xlu1 %v246_v52 }
 0x2f3   :  { %v252_v53 = vpop.xlane.xlu2 %251  ;;  %v248_v54 = vpop.xlane.xlu1 %247 }
 0x2f4   :  { %v253_v55 = vmul.f32 0.5, %v252_v53  ;;  %v249_v56 = vmul.f32 0.5, %v248_v54 }
 0x2f6   :  { %v254_v57 = vadd.f32 %v253_v55, %v249_v56 }
 0x2f8   :  { %vm255_vm7 = vcmp.lt.f32.partialorder %v244_v49, %v254_v57  ;;  %vm256_vm8 = vcmp.lt.f32.partialorder %v245_v50, %v254_v57 }
 0x2f9   :  { %vm1281_vm9 = vmneg %vm255_vm7  ;;  %v257_v59 = vsel %vm255_vm7, 0.0, %v244_v49  ;;  %v258_v60 = vsel %vm256_vm8, 0.0, %v245_v50 }
 0x2fa   :  { %vm1283_vm10 = vmpackc.low %vm1281_vm9, %vm1281_vm9  ;;  %v259_v61 = vadd.f32 %v258_v60, %v257_v59 }
 0x2fb   :  { %1285 = vmatmul.msk.bf16.vlgmr.msrb.gmra.mxu2 %vm1283_vm10, %v1284_v58  ;;  %vm1286_vm11 = vmneg %vm256_vm8 }
 0x2fc   :  { %vm1288_vm12 = vmpackc.low %vm1286_vm11, %vm1286_vm11  ;;  %260 = vadd.xlane.f32.xlu2 %v259_v61  ;;  %490 = vmatpush.bf16.xpose.msrb.mxu2 %v1633_v3 }
 0x2fd   :  { %1290 = vmatmul.msk.bf16.vlgmr.msrb.gmra.mxu3 %vm1288_vm12, %v1289_v62 }
 0x2fe   :  { %503 = vmatpush.bf16.xpose.msrb.mxu3 %v1635_v7 }
 0x304   :  { %491 = vmatpush.bf16.xpose.msrb.mxu2 %v1638_v10 }
 0x306   :  { %504 = vmatpush.bf16.xpose.msrb.mxu3 %v1642_v12 }
 0x36f   :  { %v261_v63 = vpop.xlane.xlu2 %260 }
 0x370   :  { %1415 = vrcp.f32 %v261_v63 }
 0x376   :  { %v1416_v4 = vpop.eup %1415 }
 0x37e   :  { %v273_v0 = vpop.f32.mrf.mxu2 }
 0x380   :  { %v286_v1 = vpop.f32.mrf.mxu3 }
 0x381   :  { %v287_v2 = vadd.f32 %v286_v1, %v273_v0 }
 0x383   :  { %v291_v5 = vmul.f32 %v1416_v4, %v287_v2 }
 0x385   :  { %v292_v6 = vpack.c.bf16 %v291_v5, %v291_v5 }
 0x386   :  { %v275_v8 = vpop.f32.mrf.mxu2 }
 0x387   :  { %1291 = vmatmul.msk.bf16.vlgmr.msra.gmra.mxu0 %vm72_vm0, %v292_v6  ;;  %1292 = vmatmul.msk.bf16.vlgmr.msra.gmra.mxu1 %vm72_vm0, %v292_v6 }
 0x388   :  { %v288_v9 = vpop.f32.mrf.mxu3  ;;  %522 = vmatpush.bf16.msra.mxu0 %v1633_v3  ;;  %535 = vmatpush.bf16.msra.mxu1 %v1635_v7 }
 0x38c   :  { %523 = vmatpush.bf16.msra.mxu0 %v1638_v10  ;;  %536 = vmatpush.bf16.msra.mxu1 %v1642_v12 }
 0x404   :  { %v305_v11 = vpop.f32.mrf.mxu0  ;;  %v318_v13 = vpop.f32.mrf.mxu1 }
 0x405   :  { %v322_v14 = vrot.slane %v305_v11, 4  ;;  %v328_v15 = vrot.slane %v318_v13, 4 }
 0x407   :  { %v323_v16 = vmax.f32 %v305_v11, %v322_v14  ;;  %v329_v17 = vmax.f32 %v318_v13, %v328_v15 }
 0x409   :  { %v324_v18 = vrot.slane %v323_v16, 2  ;;  %v330_v19 = vrot.slane %v329_v17, 2 }
 0x40b   :  { %v325_v20 = vmax.f32 %v323_v16, %v324_v18  ;;  %v331_v21 = vmax.f32 %v329_v17, %v330_v19 }
 0x40c   :  { %v307_v22 = vpop.f32.mrf.mxu0  ;;  %v320_v23 = vpop.f32.mrf.mxu1 }
 0x40d   :  { %v326_v24 = vrot.slane %v325_v20, 1  ;;  %v332_v25 = vrot.slane %v331_v21, 1 }
 0x40f   :  { %v327_v26 = vmax.f32 %v325_v20, %v326_v24  ;;  %v333_v27 = vmax.f32 %v331_v21, %v332_v25 }
 0x411   :  { %v334_v28 = vsub.f32 %v305_v11, %v327_v26  ;;  %v335_v29 = vsub.f32 %v318_v13, %v333_v27 }
 0x413   :  { %v336_v30 = vmul.f32 1.442695, %v334_v28  ;;  %v338_v31 = vmul.f32 1.442695, %v335_v29 }
 0x415   :  { %1417 = vpow2.f32 %v336_v30 }
 0x416   :  { %1419 = vpow2.f32 %v338_v31 }
 0x41b   :  { %v1418_v32 = vpop.eup %1417 }
 0x41c   :  { %v1420_v33 = vpop.eup %1419  ;;  %v340_v34 = vrot.slane %v1418_v32, 4 }
 0x41d   :  { %v346_v35 = vrot.slane %v1420_v33, 4 }
 0x41e   :  { %v341_v36 = vadd.f32 %v1418_v32, %v340_v34 }
 0x41f   :  { %v347_v37 = vadd.f32 %v1420_v33, %v346_v35 }
 0x420   :  { %v342_v38 = vrot.slane %v341_v36, 2 }
 0x421   :  { %v348_v39 = vrot.slane %v347_v37, 2 }
 0x422   :  { %v343_v40 = vadd.f32 %v342_v38, %v341_v36 }
 0x423   :  { %v349_v41 = vadd.f32 %v348_v39, %v347_v37 }
 0x424   :  { %v344_v42 = vrot.slane %v343_v40, 1 }
 0x425   :  { %v350_v43 = vrot.slane %v349_v41, 1 }
 0x426   :  { %v345_v44 = vadd.f32 %v344_v42, %v343_v40 }
 0x427   :  { %v351_v45 = vadd.f32 %v350_v43, %v349_v41 }
 0x428   :  { %1421 = vrcp.f32 %v345_v44 }
 0x429   :  { %1423 = vrcp.f32 %v351_v45 }
 0x42e   :  { %v1422_v46 = vpop.eup %1421 }
 0x42f   :  { %v1424_v47 = vpop.eup %1423  ;;  %v354_v48 = vmul.f32 %v1422_v46, %v1418_v32 }
 0x430   :  { %v355_v49 = vmul.f32 %v1424_v47, %v1420_v33 }
 0x431   :  { %v1296_v59 = vpack.c.bf16 %v354_v48, %v354_v48 }
 0x432   :  { %v360_v50 = vmin.f32 %v354_v48, %v355_v49  ;;  %v356_v51 = vmax.f32 %v354_v48, %v355_v49  ;;  %v1301_v61 = vpack.c.bf16 %v355_v49, %v355_v49 }
 0x434   :  { %361 = vmin.xlane.f32.xlu1 %v360_v50  ;;  %357 = vmax.xlane.f32.xlu0 %v356_v51 }
 0x4a7   :  { %v362_v52 = vpop.xlane.xlu1 %361  ;;  %v358_v53 = vpop.xlane.xlu0 %357 }
 0x4a8   :  { %v363_v54 = vmul.f32 0.5, %v362_v52  ;;  %v359_v55 = vmul.f32 0.5, %v358_v53 }
 0x4aa   :  { %v364_v56 = vadd.f32 %v363_v54, %v359_v55 }
 0x4ac   :  { %vm365_vm13 = vcmp.lt.f32.partialorder %v354_v48, %v364_v56  ;;  %vm366_vm14 = vcmp.lt.f32.partialorder %v355_v49, %v364_v56 }
 0x4ad   :  { %vm1293_vm15 = vmneg %vm365_vm13  ;;  %v367_v57 = vsel %vm365_vm13, 0.0, %v354_v48  ;;  %v368_v58 = vsel %vm366_vm14, 0.0, %v355_v49 }
 0x4ae   :  { %vm1298_vm1 = vmneg %vm366_vm14  ;;  %v369_v60 = vadd.f32 %v368_v58, %v367_v57 }
 0x4af   :  { %vm1295_vm2 = vmpackc.low %vm1293_vm15, %vm1293_vm15 }
 0x4b0   :  { %1297 = vmatmul.msk.bf16.vlgmr.msra.gmra.mxu2 %vm1295_vm2, %v1296_v59  ;;  %vm1300_vm3 = vmpackc.low %vm1298_vm1, %vm1298_vm1  ;;  %370 = vadd.xlane.f32.xlu2 %v369_v60 }
 0x4b1   :  { %1302 = vmatmul.msk.bf16.vlgmr.msra.gmra.mxu3 %vm1300_vm3, %v1301_v61  ;;  %600 = vmatpush.bf16.xpose.msra.mxu2 %v1633_v3 }
 0x4b2   :  { %613 = vmatpush.bf16.xpose.msra.mxu3 %v1635_v7 }
 0x4b9   :  { %601 = vmatpush.bf16.xpose.msra.mxu2 %v1638_v10 }
 0x4ba   :  { %614 = vmatpush.bf16.xpose.msra.mxu3 %v1642_v12 }
 0x523   :  { %v371_v62 = vpop.xlane.xlu2 %370 }
 0x524   :  { %1425 = vrcp.f32 %v371_v62 }
 0x52a   :  { %v1426_v2 = vpop.eup %1425 }
 0x533   :  { %v383_v63 = vpop.f32.mrf.mxu2 }
 0x534   :  { %v396_v0 = vpop.f32.mrf.mxu3 }
 0x535   :  { %v397_v1 = vadd.f32 %v396_v0, %v383_v63 }
 0x537   :  { %v401_v4 = vmul.f32 %v1426_v2, %v397_v1 }
 0x539   :  { %v402_v5 = vpack.c.bf16 %v401_v4, %v401_v4 }
 0x53b   :  { %1303 = vmatmul.msk.bf16.vlgmr.msrb.gmra.mxu0 %vm72_vm0, %v402_v5  ;;  %1304 = vmatmul.msk.bf16.vlgmr.msrb.gmra.mxu1 %vm72_vm0, %v402_v5  ;;  %v385_v6 = vpop.f32.mrf.mxu2 }
 0x53c   :  { %v398_v8 = vpop.f32.mrf.mxu3  ;;  %632 = vmatpush.bf16.msrb.mxu0 %v1633_v3  ;;  %645 = vmatpush.bf16.msrb.mxu1 %v1635_v7 }
 0x540   :  { %633 = vmatpush.bf16.msrb.mxu0 %v1638_v10  ;;  %646 = vmatpush.bf16.msrb.mxu1 %v1642_v12 }
 0x5b8   :  { %v415_v9 = vpop.f32.mrf.mxu0  ;;  %v428_v11 = vpop.f32.mrf.mxu1 }
 0x5b9   :  { %v432_v13 = vrot.slane %v415_v9, 4  ;;  %v438_v14 = vrot.slane %v428_v11, 4 }
 0x5bb   :  { %v433_v15 = vmax.f32 %v415_v9, %v432_v13  ;;  %v439_v16 = vmax.f32 %v428_v11, %v438_v14 }
 0x5bd   :  { %v434_v17 = vrot.slane %v433_v15, 2  ;;  %v440_v18 = vrot.slane %v439_v16, 2 }
 0x5bf   :  { %v435_v19 = vmax.f32 %v433_v15, %v434_v17  ;;  %v441_v20 = vmax.f32 %v439_v16, %v440_v18 }
 0x5c0   :  { %v417_v21 = vpop.f32.mrf.mxu0  ;;  %v430_v22 = vpop.f32.mrf.mxu1 }
 0x5c1   :  { %v436_v23 = vrot.slane %v435_v19, 1  ;;  %v442_v24 = vrot.slane %v441_v20, 1 }
 0x5c3   :  { %v437_v25 = vmax.f32 %v435_v19, %v436_v23  ;;  %v443_v26 = vmax.f32 %v441_v20, %v442_v24 }
 0x5c5   :  { %v444_v27 = vsub.f32 %v415_v9, %v437_v25  ;;  %v445_v28 = vsub.f32 %v428_v11, %v443_v26 }
 0x5c7   :  { %v446_v29 = vmul.f32 1.442695, %v444_v27  ;;  %v448_v30 = vmul.f32 1.442695, %v445_v28 }
 0x5c9   :  { %1427 = vpow2.f32 %v446_v29 }
 0x5ca   :  { %1429 = vpow2.f32 %v448_v30 }
 0x5cf   :  { %v1428_v31 = vpop.eup %1427 }
 0x5d0   :  { %v1430_v32 = vpop.eup %1429  ;;  %v450_v33 = vrot.slane %v1428_v31, 4 }
 0x5d1   :  { %v456_v34 = vrot.slane %v1430_v32, 4 }
 0x5d2   :  { %v451_v35 = vadd.f32 %v1428_v31, %v450_v33 }
 0x5d3   :  { %v457_v36 = vadd.f32 %v1430_v32, %v456_v34 }
 0x5d4   :  { %v452_v37 = vrot.slane %v451_v35, 2 }
 0x5d5   :  { %v458_v38 = vrot.slane %v457_v36, 2 }
 0x5d6   :  { %v453_v39 = vadd.f32 %v452_v37, %v451_v35 }
 0x5d7   :  { %v459_v40 = vadd.f32 %v458_v38, %v457_v36 }
 0x5d8   :  { %v454_v41 = vrot.slane %v453_v39, 1 }
 0x5d9   :  { %v460_v42 = vrot.slane %v459_v40, 1 }
 0x5da   :  { %v455_v43 = vadd.f32 %v454_v41, %v453_v39 }
 0x5db   :  { %v461_v44 = vadd.f32 %v460_v42, %v459_v40 }
 0x5dc   :  { %1431 = vrcp.f32 %v455_v43 }
 0x5dd   :  { %1433 = vrcp.f32 %v461_v44 }
 0x5e2   :  { %v1432_v45 = vpop.eup %1431 }
 0x5e3   :  { %v1434_v46 = vpop.eup %1433  ;;  %v464_v47 = vmul.f32 %v1432_v45, %v1428_v31 }
 0x5e4   :  { %v465_v48 = vmul.f32 %v1434_v46, %v1430_v32 }
 0x5e5   :  { %v1308_v58 = vpack.c.bf16 %v464_v47, %v464_v47 }
 0x5e6   :  { %v470_v49 = vmin.f32 %v464_v47, %v465_v48  ;;  %v466_v50 = vmax.f32 %v464_v47, %v465_v48  ;;  %v1313_v60 = vpack.c.bf16 %v465_v48, %v465_v48 }
 0x5e8   :  { %471 = vmin.xlane.f32.xlu1 %v470_v49  ;;  %467 = vmax.xlane.f32.xlu0 %v466_v50 }
 0x65b   :  { %v472_v51 = vpop.xlane.xlu1 %471  ;;  %v468_v52 = vpop.xlane.xlu0 %467 }
 0x65c   :  { %v473_v53 = vmul.f32 0.5, %v472_v51  ;;  %v469_v54 = vmul.f32 0.5, %v468_v52 }
 0x65e   :  { %v474_v55 = vadd.f32 %v473_v53, %v469_v54 }
 0x660   :  { %vm475_vm4 = vcmp.lt.f32.partialorder %v464_v47, %v474_v55  ;;  %vm476_vm5 = vcmp.lt.f32.partialorder %v465_v48, %v474_v55 }
 0x661   :  { %vm1305_vm6 = vmneg %vm475_vm4  ;;  %v477_v56 = vsel %vm475_vm4, 0.0, %v464_v47  ;;  %v478_v57 = vsel %vm476_vm5, 0.0, %v465_v48 }
 0x662   :  { %vm1310_vm7 = vmneg %vm476_vm5  ;;  %v479_v59 = vadd.f32 %v478_v57, %v477_v56 }
 0x663   :  { %vm1307_vm8 = vmpackc.low %vm1305_vm6, %vm1305_vm6 }
 0x664   :  { %1309 = vmatmul.msk.bf16.vlgmr.msrb.gmra.mxu2 %vm1307_vm8, %v1308_v58  ;;  %vm1312_vm9 = vmpackc.low %vm1310_vm7, %vm1310_vm7  ;;  %480 = vadd.xlane.f32.xlu2 %v479_v59 }
 0x665   :  { %1314 = vmatmul.msk.bf16.vlgmr.msrb.gmra.mxu3 %vm1312_vm9, %v1313_v60  ;;  %710 = vmatpush.bf16.xpose.msrb.mxu2 %v1633_v3 }
 0x666   :  { %723 = vmatpush.bf16.xpose.msrb.mxu3 %v1635_v7 }
 0x66d   :  { %711 = vmatpush.bf16.xpose.msrb.mxu2 %v1638_v10 }
 0x66e   :  { %724 = vmatpush.bf16.xpose.msrb.mxu3 %v1642_v12 }
 0x6d7   :  { %v481_v61 = vpop.xlane.xlu2 %480 }
 0x6d8   :  { %1435 = vrcp.f32 %v481_v61 }
 0x6de   :  { %v1436_v1 = vpop.eup %1435 }
 0x6e7   :  { %v493_v62 = vpop.f32.mrf.mxu2 }
 0x6e8   :  { %v506_v63 = vpop.f32.mrf.mxu3 }
 0x6e9   :  { %v507_v0 = vadd.f32 %v506_v63, %v493_v62 }
 0x6eb   :  { %v511_v2 = vmul.f32 %v1436_v1, %v507_v0 }
 0x6ed   :  { %v512_v4 = vpack.c.bf16 %v511_v2, %v511_v2 }
 0x6ef   :  { %1315 = vmatmul.msk.bf16.vlgmr.msra.gmra.mxu0 %vm72_vm0, %v512_v4  ;;  %1316 = vmatmul.msk.bf16.vlgmr.msra.gmra.mxu1 %vm72_vm0, %v512_v4  ;;  %v495_v5 = vpop.f32.mrf.mxu2 }
 0x6f0   :  { %v508_v6 = vpop.f32.mrf.mxu3  ;;  %742 = vmatpush.bf16.msra.mxu0 %v1633_v3  ;;  %755 = vmatpush.bf16.msra.mxu1 %v1635_v7 }
 0x6f4   :  { %743 = vmatpush.bf16.msra.mxu0 %v1638_v10  ;;  %756 = vmatpush.bf16.msra.mxu1 %v1642_v12 }
 0x76c   :  { %v525_v8 = vpop.f32.mrf.mxu0  ;;  %v538_v9 = vpop.f32.mrf.mxu1 }
 0x76d   :  { %v542_v11 = vrot.slane %v525_v8, 4  ;;  %v548_v13 = vrot.slane %v538_v9, 4 }
 0x76f   :  { %v543_v14 = vmax.f32 %v525_v8, %v542_v11  ;;  %v549_v15 = vmax.f32 %v538_v9, %v548_v13 }
 0x771   :  { %v544_v16 = vrot.slane %v543_v14, 2  ;;  %v550_v17 = vrot.slane %v549_v15, 2 }
 0x773   :  { %v545_v18 = vmax.f32 %v543_v14, %v544_v16  ;;  %v551_v19 = vmax.f32 %v549_v15, %v550_v17 }
 0x774   :  { %v527_v20 = vpop.f32.mrf.mxu0  ;;  %v540_v21 = vpop.f32.mrf.mxu1 }
 0x775   :  { %v546_v22 = vrot.slane %v545_v18, 1  ;;  %v552_v23 = vrot.slane %v551_v19, 1 }
 0x777   :  { %v547_v24 = vmax.f32 %v545_v18, %v546_v22  ;;  %v553_v25 = vmax.f32 %v551_v19, %v552_v23 }
 0x779   :  { %v554_v26 = vsub.f32 %v525_v8, %v547_v24  ;;  %v555_v27 = vsub.f32 %v538_v9, %v553_v25 }
 0x77b   :  { %v556_v28 = vmul.f32 1.442695, %v554_v26  ;;  %v558_v29 = vmul.f32 1.442695, %v555_v27 }
 0x77d   :  { %1437 = vpow2.f32 %v556_v28 }
 0x77e   :  { %1439 = vpow2.f32 %v558_v29 }
 0x783   :  { %v1438_v30 = vpop.eup %1437 }
 0x784   :  { %v1440_v31 = vpop.eup %1439  ;;  %v560_v32 = vrot.slane %v1438_v30, 4 }
 0x785   :  { %v566_v33 = vrot.slane %v1440_v31, 4 }
 0x786   :  { %v561_v34 = vadd.f32 %v1438_v30, %v560_v32 }
 0x787   :  { %v567_v35 = vadd.f32 %v1440_v31, %v566_v33 }
 0x788   :  { %v562_v36 = vrot.slane %v561_v34, 2 }
 0x789   :  { %v568_v37 = vrot.slane %v567_v35, 2 }
 0x78a   :  { %v563_v38 = vadd.f32 %v562_v36, %v561_v34 }
 0x78b   :  { %v569_v39 = vadd.f32 %v568_v37, %v567_v35 }
 0x78c   :  { %v564_v40 = vrot.slane %v563_v38, 1 }
 0x78d   :  { %v570_v41 = vrot.slane %v569_v39, 1 }
 0x78e   :  { %v565_v42 = vadd.f32 %v564_v40, %v563_v38 }
 0x78f   :  { %v571_v43 = vadd.f32 %v570_v41, %v569_v39 }
 0x790   :  { %1441 = vrcp.f32 %v565_v42 }
 0x791   :  { %1443 = vrcp.f32 %v571_v43 }
 0x796   :  { %v1442_v44 = vpop.eup %1441 }
 0x797   :  { %v1444_v45 = vpop.eup %1443  ;;  %v574_v46 = vmul.f32 %v1442_v44, %v1438_v30 }
 0x798   :  { %v575_v47 = vmul.f32 %v1444_v45, %v1440_v31 }
 0x799   :  { %v1320_v57 = vpack.c.bf16 %v574_v46, %v574_v46 }
 0x79a   :  { %v580_v48 = vmin.f32 %v574_v46, %v575_v47  ;;  %v576_v49 = vmax.f32 %v574_v46, %v575_v47  ;;  %v1325_v59 = vpack.c.bf16 %v575_v47, %v575_v47 }
 0x79c   :  { %581 = vmin.xlane.f32.xlu1 %v580_v48  ;;  %577 = vmax.xlane.f32.xlu0 %v576_v49 }
 0x80f   :  { %v582_v50 = vpop.xlane.xlu1 %581  ;;  %v578_v51 = vpop.xlane.xlu0 %577 }
 0x810   :  { %v583_v52 = vmul.f32 0.5, %v582_v50  ;;  %v579_v53 = vmul.f32 0.5, %v578_v51 }
 0x812   :  { %v584_v54 = vadd.f32 %v583_v52, %v579_v53 }
 0x814   :  { %vm585_vm10 = vcmp.lt.f32.partialorder %v574_v46, %v584_v54  ;;  %vm586_vm11 = vcmp.lt.f32.partialorder %v575_v47, %v584_v54 }
 0x815   :  { %vm1317_vm12 = vmneg %vm585_vm10  ;;  %v587_v55 = vsel %vm585_vm10, 0.0, %v574_v46  ;;  %v588_v56 = vsel %vm586_vm11, 0.0, %v575_v47 }
 0x816   :  { %vm1322_vm13 = vmneg %vm586_vm11  ;;  %v589_v58 = vadd.f32 %v588_v56, %v587_v55 }
 0x817   :  { %vm1319_vm14 = vmpackc.low %vm1317_vm12, %vm1317_vm12 }
 0x818   :  { %1321 = vmatmul.msk.bf16.vlgmr.msra.gmra.mxu2 %vm1319_vm14, %v1320_v57  ;;  %vm1324_vm15 = vmpackc.low %vm1322_vm13, %vm1322_vm13  ;;  %590 = vadd.xlane.f32.xlu2 %v589_v58 }
 0x819   :  { %1326 = vmatmul.msk.bf16.vlgmr.msra.gmra.mxu3 %vm1324_vm15, %v1325_v59  ;;  %820 = vmatpush.bf16.xpose.msra.mxu2 %v1633_v3 }
 0x81a   :  { %833 = vmatpush.bf16.xpose.msra.mxu3 %v1635_v7 }
 0x821   :  { %821 = vmatpush.bf16.xpose.msra.mxu2 %v1638_v10 }
 0x822   :  { %834 = vmatpush.bf16.xpose.msra.mxu3 %v1642_v12 }
 0x88b   :  { %v591_v60 = vpop.xlane.xlu2 %590 }
 0x88c   :  { %1445 = vrcp.f32 %v591_v60 }
 0x892   :  { %v1446_v0 = vpop.eup %1445 }
 0x89b   :  { %v603_v61 = vpop.f32.mrf.mxu2 }
 0x89c   :  { %v616_v62 = vpop.f32.mrf.mxu3 }
 0x89d   :  { %v617_v63 = vadd.f32 %v616_v62, %v603_v61 }
 0x89f   :  { %v621_v1 = vmul.f32 %v1446_v0, %v617_v63 }
 0x8a1   :  { %v622_v2 = vpack.c.bf16 %v621_v1, %v621_v1 }
 0x8a3   :  { %1327 = vmatmul.msk.bf16.vlgmr.msrb.gmra.mxu0 %vm72_vm0, %v622_v2  ;;  %1328 = vmatmul.msk.bf16.vlgmr.msrb.gmra.mxu1 %vm72_vm0, %v622_v2  ;;  %v605_v4 = vpop.f32.mrf.mxu2 }
 0x8a4   :  { %v618_v5 = vpop.f32.mrf.mxu3  ;;  %852 = vmatpush.bf16.msrb.mxu0 %v1633_v3  ;;  %865 = vmatpush.bf16.msrb.mxu1 %v1635_v7 }
 0x8a8   :  { %853 = vmatpush.bf16.msrb.mxu0 %v1638_v10  ;;  %866 = vmatpush.bf16.msrb.mxu1 %v1642_v12 }
 0x920   :  { %v635_v6 = vpop.f32.mrf.mxu0  ;;  %v648_v8 = vpop.f32.mrf.mxu1 }
 0x921   :  { %v652_v9 = vrot.slane %v635_v6, 4  ;;  %v658_v11 = vrot.slane %v648_v8, 4 }
 0x923   :  { %v653_v13 = vmax.f32 %v635_v6, %v652_v9  ;;  %v659_v14 = vmax.f32 %v648_v8, %v658_v11 }
 0x925   :  { %v654_v15 = vrot.slane %v653_v13, 2  ;;  %v660_v16 = vrot.slane %v659_v14, 2 }
 0x927   :  { %v655_v17 = vmax.f32 %v653_v13, %v654_v15  ;;  %v661_v18 = vmax.f32 %v659_v14, %v660_v16 }
 0x928   :  { %v637_v19 = vpop.f32.mrf.mxu0  ;;  %v650_v20 = vpop.f32.mrf.mxu1 }
 0x929   :  { %v656_v21 = vrot.slane %v655_v17, 1  ;;  %v662_v22 = vrot.slane %v661_v18, 1 }
 0x92b   :  { %v657_v23 = vmax.f32 %v655_v17, %v656_v21  ;;  %v663_v24 = vmax.f32 %v661_v18, %v662_v22 }
 0x92d   :  { %v664_v25 = vsub.f32 %v635_v6, %v657_v23  ;;  %v665_v26 = vsub.f32 %v648_v8, %v663_v24 }
 0x92f   :  { %v666_v27 = vmul.f32 1.442695, %v664_v25  ;;  %v668_v28 = vmul.f32 1.442695, %v665_v26 }
 0x931   :  { %1447 = vpow2.f32 %v666_v27 }
 0x932   :  { %1449 = vpow2.f32 %v668_v28 }
 0x937   :  { %v1448_v29 = vpop.eup %1447 }
 0x938   :  { %v1450_v30 = vpop.eup %1449  ;;  %v670_v31 = vrot.slane %v1448_v29, 4 }
 0x939   :  { %v676_v32 = vrot.slane %v1450_v30, 4 }
 0x93a   :  { %v671_v33 = vadd.f32 %v1448_v29, %v670_v31 }
 0x93b   :  { %v677_v34 = vadd.f32 %v1450_v30, %v676_v32 }
 0x93c   :  { %v672_v35 = vrot.slane %v671_v33, 2 }
 0x93d   :  { %v678_v36 = vrot.slane %v677_v34, 2 }
 0x93e   :  { %v673_v37 = vadd.f32 %v672_v35, %v671_v33 }
 0x93f   :  { %v679_v38 = vadd.f32 %v678_v36, %v677_v34 }
 0x940   :  { %v674_v39 = vrot.slane %v673_v37, 1 }
 0x941   :  { %v680_v40 = vrot.slane %v679_v38, 1 }
 0x942   :  { %v675_v41 = vadd.f32 %v674_v39, %v673_v37 }
 0x943   :  { %v681_v42 = vadd.f32 %v680_v40, %v679_v38 }
 0x944   :  { %1451 = vrcp.f32 %v675_v41 }
 0x945   :  { %1453 = vrcp.f32 %v681_v42 }
 0x94a   :  { %v1452_v43 = vpop.eup %1451 }
 0x94b   :  { %v1454_v44 = vpop.eup %1453  ;;  %v684_v45 = vmul.f32 %v1452_v43, %v1448_v29 }
 0x94c   :  { %v685_v46 = vmul.f32 %v1454_v44, %v1450_v30 }
 0x94d   :  { %v1332_v56 = vpack.c.bf16 %v684_v45, %v684_v45 }
 0x94e   :  { %v690_v47 = vmin.f32 %v684_v45, %v685_v46  ;;  %v686_v48 = vmax.f32 %v684_v45, %v685_v46  ;;  %v1337_v58 = vpack.c.bf16 %v685_v46, %v685_v46 }
 0x950   :  { %691 = vmin.xlane.f32.xlu1 %v690_v47  ;;  %687 = vmax.xlane.f32.xlu0 %v686_v48 }
 0x9c3   :  { %v692_v49 = vpop.xlane.xlu1 %691  ;;  %v688_v50 = vpop.xlane.xlu0 %687 }
 0x9c4   :  { %v693_v51 = vmul.f32 0.5, %v692_v49  ;;  %v689_v52 = vmul.f32 0.5, %v688_v50 }
 0x9c6   :  { %v694_v53 = vadd.f32 %v693_v51, %v689_v52 }
 0x9c8   :  { %vm695_vm1 = vcmp.lt.f32.partialorder %v684_v45, %v694_v53  ;;  %vm696_vm2 = vcmp.lt.f32.partialorder %v685_v46, %v694_v53 }
 0x9c9   :  { %vm1329_vm3 = vmneg %vm695_vm1  ;;  %v697_v54 = vsel %vm695_vm1, 0.0, %v684_v45  ;;  %v698_v55 = vsel %vm696_vm2, 0.0, %v685_v46 }
 0x9ca   :  { %vm1334_vm4 = vmneg %vm696_vm2  ;;  %v699_v57 = vadd.f32 %v698_v55, %v697_v54 }
 0x9cb   :  { %vm1331_vm5 = vmpackc.low %vm1329_vm3, %vm1329_vm3 }
 0x9cc   :  { %1333 = vmatmul.msk.bf16.vlgmr.msrb.gmra.mxu2 %vm1331_vm5, %v1332_v56  ;;  %vm1336_vm6 = vmpackc.low %vm1334_vm4, %vm1334_vm4  ;;  %700 = vadd.xlane.f32.xlu2 %v699_v57 }
 0x9cd   :  { %1338 = vmatmul.msk.bf16.vlgmr.msrb.gmra.mxu3 %vm1336_vm6, %v1337_v58  ;;  %930 = vmatpush.bf16.xpose.msrb.mxu2 %v1633_v3 }
 0x9ce   :  { %943 = vmatpush.bf16.xpose.msrb.mxu3 %v1635_v7 }
 0x9d5   :  { %931 = vmatpush.bf16.xpose.msrb.mxu2 %v1638_v10 }
 0x9d6   :  { %944 = vmatpush.bf16.xpose.msrb.mxu3 %v1642_v12 }
 0xa3f   :  { %v701_v59 = vpop.xlane.xlu2 %700 }
 0xa40   :  { %1455 = vrcp.f32 %v701_v59 }
 0xa46   :  { %v1456_v63 = vpop.eup %1455 }
 0xa4f   :  { %v713_v60 = vpop.f32.mrf.mxu2 }
 0xa50   :  { %v726_v61 = vpop.f32.mrf.mxu3 }
 0xa51   :  { %v727_v62 = vadd.f32 %v726_v61, %v713_v60 }
 0xa53   :  { %v731_v0 = vmul.f32 %v1456_v63, %v727_v62 }
 0xa55   :  { %v732_v1 = vpack.c.bf16 %v731_v0, %v731_v0 }
 0xa57   :  { %1339 = vmatmul.msk.bf16.vlgmr.msra.gmra.mxu0 %vm72_vm0, %v732_v1  ;;  %1340 = vmatmul.msk.bf16.vlgmr.msra.gmra.mxu1 %vm72_vm0, %v732_v1  ;;  %v715_v2 = vpop.f32.mrf.mxu2 }
 0xa58   :  { %v728_v4 = vpop.f32.mrf.mxu3  ;;  %962 = vmatpush.bf16.msra.mxu0 %v1633_v3  ;;  %975 = vmatpush.bf16.msra.mxu1 %v1635_v7 }
 0xa5c   :  { %963 = vmatpush.bf16.msra.mxu0 %v1638_v10  ;;  %976 = vmatpush.bf16.msra.mxu1 %v1642_v12 }
 0xad4   :  { %v745_v5 = vpop.f32.mrf.mxu0  ;;  %v758_v6 = vpop.f32.mrf.mxu1 }
 0xad5   :  { %v762_v8 = vrot.slane %v745_v5, 4  ;;  %v768_v9 = vrot.slane %v758_v6, 4 }
 0xad7   :  { %v763_v11 = vmax.f32 %v745_v5, %v762_v8  ;;  %v769_v13 = vmax.f32 %v758_v6, %v768_v9 }
 0xad9   :  { %v764_v14 = vrot.slane %v763_v11, 2  ;;  %v770_v15 = vrot.slane %v769_v13, 2 }
 0xadb   :  { %v765_v16 = vmax.f32 %v763_v11, %v764_v14  ;;  %v771_v17 = vmax.f32 %v769_v13, %v770_v15 }
 0xadc   :  { %v747_v18 = vpop.f32.mrf.mxu0  ;;  %v760_v19 = vpop.f32.mrf.mxu1 }
 0xadd   :  { %v766_v20 = vrot.slane %v765_v16, 1  ;;  %v772_v21 = vrot.slane %v771_v17, 1 }
 0xadf   :  { %v767_v22 = vmax.f32 %v765_v16, %v766_v20  ;;  %v773_v23 = vmax.f32 %v771_v17, %v772_v21 }
 0xae1   :  { %v774_v24 = vsub.f32 %v745_v5, %v767_v22  ;;  %v775_v25 = vsub.f32 %v758_v6, %v773_v23 }
 0xae3   :  { %v776_v26 = vmul.f32 1.442695, %v774_v24  ;;  %v778_v27 = vmul.f32 1.442695, %v775_v25 }
 0xae5   :  { %1457 = vpow2.f32 %v776_v26 }
 0xae6   :  { %1459 = vpow2.f32 %v778_v27 }
 0xaeb   :  { %v1458_v28 = vpop.eup %1457 }
 0xaec   :  { %v1460_v29 = vpop.eup %1459  ;;  %v780_v30 = vrot.slane %v1458_v28, 4 }
 0xaed   :  { %v786_v31 = vrot.slane %v1460_v29, 4 }
 0xaee   :  { %v781_v32 = vadd.f32 %v1458_v28, %v780_v30 }
 0xaef   :  { %v787_v33 = vadd.f32 %v1460_v29, %v786_v31 }
 0xaf0   :  { %v782_v34 = vrot.slane %v781_v32, 2 }
 0xaf1   :  { %v788_v35 = vrot.slane %v787_v33, 2 }
 0xaf2   :  { %v783_v36 = vadd.f32 %v782_v34, %v781_v32 }
 0xaf3   :  { %v789_v37 = vadd.f32 %v788_v35, %v787_v33 }
 0xaf4   :  { %v784_v38 = vrot.slane %v783_v36, 1 }
 0xaf5   :  { %v790_v39 = vrot.slane %v789_v37, 1 }
 0xaf6   :  { %v785_v40 = vadd.f32 %v784_v38, %v783_v36 }
 0xaf7   :  { %v791_v41 = vadd.f32 %v790_v39, %v789_v37 }
 0xaf8   :  { %1461 = vrcp.f32 %v785_v40 }
 0xaf9   :  { %1463 = vrcp.f32 %v791_v41 }
 0xafe   :  { %v1462_v42 = vpop.eup %1461 }
 0xaff   :  { %v1464_v43 = vpop.eup %1463  ;;  %v794_v44 = vmul.f32 %v1462_v42, %v1458_v28 }
 0xb00   :  { %v795_v45 = vmul.f32 %v1464_v43, %v1460_v29 }
 0xb01   :  { %v1344_v55 = vpack.c.bf16 %v794_v44, %v794_v44 }
 0xb02   :  { %v800_v46 = vmin.f32 %v794_v44, %v795_v45  ;;  %v796_v47 = vmax.f32 %v794_v44, %v795_v45  ;;  %v1349_v57 = vpack.c.bf16 %v795_v45, %v795_v45 }
 0xb04   :  { %801 = vmin.xlane.f32.xlu1 %v800_v46  ;;  %797 = vmax.xlane.f32.xlu0 %v796_v47 }
 0xb77   :  { %v802_v48 = vpop.xlane.xlu1 %801  ;;  %v798_v49 = vpop.xlane.xlu0 %797 }
 0xb78   :  { %v803_v50 = vmul.f32 0.5, %v802_v48  ;;  %v799_v51 = vmul.f32 0.5, %v798_v49 }
 0xb7a   :  { %v804_v52 = vadd.f32 %v803_v50, %v799_v51 }
 0xb7c   :  { %vm805_vm7 = vcmp.lt.f32.partialorder %v794_v44, %v804_v52  ;;  %vm806_vm8 = vcmp.lt.f32.partialorder %v795_v45, %v804_v52 }
 0xb7d   :  { %vm1341_vm9 = vmneg %vm805_vm7  ;;  %v807_v53 = vsel %vm805_vm7, 0.0, %v794_v44  ;;  %v808_v54 = vsel %vm806_vm8, 0.0, %v795_v45 }
 0xb7e   :  { %vm1346_vm10 = vmneg %vm806_vm8  ;;  %v809_v56 = vadd.f32 %v808_v54, %v807_v53 }
 0xb7f   :  { %vm1343_vm11 = vmpackc.low %vm1341_vm9, %vm1341_vm9 }
 0xb80   :  { %1345 = vmatmul.msk.bf16.vlgmr.msra.gmra.mxu2 %vm1343_vm11, %v1344_v55  ;;  %vm1348_vm12 = vmpackc.low %vm1346_vm10, %vm1346_vm10  ;;  %810 = vadd.xlane.f32.xlu2 %v809_v56 }
 0xb81   :  { %1350 = vmatmul.msk.bf16.vlgmr.msra.gmra.mxu3 %vm1348_vm12, %v1349_v57  ;;  %1040 = vmatpush.bf16.xpose.msra.mxu2 %v1633_v3 }
 0xb82   :  { %1053 = vmatpush.bf16.xpose.msra.mxu3 %v1635_v7 }
 0xb89   :  { %1041 = vmatpush.bf16.xpose.msra.mxu2 %v1638_v10 }
 0xb8a   :  { %1054 = vmatpush.bf16.xpose.msra.mxu3 %v1642_v12 }
 0xbf3   :  { %v811_v58 = vpop.xlane.xlu2 %810 }
 0xbf4   :  { %1465 = vrcp.f32 %v811_v58 }
 0xbfa   :  { %v1466_v62 = vpop.eup %1465 }
 0xc03   :  { %v823_v59 = vpop.f32.mrf.mxu2 }
 0xc04   :  { %v836_v60 = vpop.f32.mrf.mxu3 }
 0xc05   :  { %v837_v61 = vadd.f32 %v836_v60, %v823_v59 }
 0xc07   :  { %v841_v63 = vmul.f32 %v1466_v62, %v837_v61 }
 0xc09   :  { %v842_v0 = vpack.c.bf16 %v841_v63, %v841_v63 }
 0xc0b   :  { %1351 = vmatmul.msk.bf16.vlgmr.msrb.gmra.mxu0 %vm72_vm0, %v842_v0  ;;  %1352 = vmatmul.msk.bf16.vlgmr.msrb.gmra.mxu1 %vm72_vm0, %v842_v0  ;;  %v825_v1 = vpop.f32.mrf.mxu2 }
 0xc0c   :  { %v838_v2 = vpop.f32.mrf.mxu3  ;;  %1072 = vmatpush.bf16.msrb.mxu0 %v1633_v3  ;;  %1085 = vmatpush.bf16.msrb.mxu1 %v1635_v7 }
 0xc10   :  { %1073 = vmatpush.bf16.msrb.mxu0 %v1638_v10  ;;  %1086 = vmatpush.bf16.msrb.mxu1 %v1642_v12 }
 0xc88   :  { %v855_v4 = vpop.f32.mrf.mxu0  ;;  %v868_v5 = vpop.f32.mrf.mxu1 }
 0xc89   :  { %v872_v6 = vrot.slane %v855_v4, 4  ;;  %v878_v8 = vrot.slane %v868_v5, 4 }
 0xc8b   :  { %v873_v9 = vmax.f32 %v855_v4, %v872_v6  ;;  %v879_v11 = vmax.f32 %v868_v5, %v878_v8 }
 0xc8d   :  { %v874_v13 = vrot.slane %v873_v9, 2  ;;  %v880_v14 = vrot.slane %v879_v11, 2 }
 0xc8f   :  { %v875_v15 = vmax.f32 %v873_v9, %v874_v13  ;;  %v881_v16 = vmax.f32 %v879_v11, %v880_v14 }
 0xc90   :  { %v857_v17 = vpop.f32.mrf.mxu0  ;;  %v870_v18 = vpop.f32.mrf.mxu1 }
 0xc91   :  { %v876_v19 = vrot.slane %v875_v15, 1  ;;  %v882_v20 = vrot.slane %v881_v16, 1 }
 0xc93   :  { %v877_v21 = vmax.f32 %v875_v15, %v876_v19  ;;  %v883_v22 = vmax.f32 %v881_v16, %v882_v20 }
 0xc95   :  { %v884_v23 = vsub.f32 %v855_v4, %v877_v21  ;;  %v885_v24 = vsub.f32 %v868_v5, %v883_v22 }
 0xc97   :  { %v886_v25 = vmul.f32 1.442695, %v884_v23  ;;  %v888_v26 = vmul.f32 1.442695, %v885_v24 }
 0xc99   :  { %1467 = vpow2.f32 %v886_v25 }
 0xc9a   :  { %1469 = vpow2.f32 %v888_v26 }
 0xc9f   :  { %v1468_v27 = vpop.eup %1467 }
 0xca0   :  { %v1470_v28 = vpop.eup %1469  ;;  %v890_v29 = vrot.slane %v1468_v27, 4 }
 0xca1   :  { %v896_v30 = vrot.slane %v1470_v28, 4 }
 0xca2   :  { %v891_v31 = vadd.f32 %v1468_v27, %v890_v29 }
 0xca3   :  { %v897_v32 = vadd.f32 %v1470_v28, %v896_v30 }
 0xca4   :  { %v892_v33 = vrot.slane %v891_v31, 2 }
 0xca5   :  { %v898_v34 = vrot.slane %v897_v32, 2 }
 0xca6   :  { %v893_v35 = vadd.f32 %v892_v33, %v891_v31 }
 0xca7   :  { %v899_v36 = vadd.f32 %v898_v34, %v897_v32 }
 0xca8   :  { %v894_v37 = vrot.slane %v893_v35, 1 }
 0xca9   :  { %v900_v38 = vrot.slane %v899_v36, 1 }
 0xcaa   :  { %v895_v39 = vadd.f32 %v894_v37, %v893_v35 }
 0xcab   :  { %v901_v40 = vadd.f32 %v900_v38, %v899_v36 }
 0xcac   :  { %1471 = vrcp.f32 %v895_v39 }
 0xcad   :  { %1473 = vrcp.f32 %v901_v40 }
 0xcb2   :  { %v1472_v41 = vpop.eup %1471 }
 0xcb3   :  { %v1474_v42 = vpop.eup %1473  ;;  %v904_v43 = vmul.f32 %v1472_v41, %v1468_v27 }
 0xcb4   :  { %v905_v44 = vmul.f32 %v1474_v42, %v1470_v28 }
 0xcb5   :  { %v1356_v54 = vpack.c.bf16 %v904_v43, %v904_v43 }
 0xcb6   :  { %v910_v45 = vmin.f32 %v904_v43, %v905_v44  ;;  %v906_v46 = vmax.f32 %v904_v43, %v905_v44  ;;  %v1361_v56 = vpack.c.bf16 %v905_v44, %v905_v44 }
 0xcb8   :  { %911 = vmin.xlane.f32.xlu1 %v910_v45  ;;  %907 = vmax.xlane.f32.xlu0 %v906_v46 }
 0xd2b   :  { %v912_v47 = vpop.xlane.xlu1 %911  ;;  %v908_v48 = vpop.xlane.xlu0 %907 }
 0xd2c   :  { %v913_v49 = vmul.f32 0.5, %v912_v47  ;;  %v909_v50 = vmul.f32 0.5, %v908_v48 }
 0xd2e   :  { %v914_v51 = vadd.f32 %v913_v49, %v909_v50 }
 0xd30   :  { %vm915_vm13 = vcmp.lt.f32.partialorder %v904_v43, %v914_v51  ;;  %vm916_vm14 = vcmp.lt.f32.partialorder %v905_v44, %v914_v51 }
 0xd31   :  { %vm1353_vm15 = vmneg %vm915_vm13  ;;  %v917_v52 = vsel %vm915_vm13, 0.0, %v904_v43  ;;  %v918_v53 = vsel %vm916_vm14, 0.0, %v905_v44 }
 0xd32   :  { %vm1358_vm1 = vmneg %vm916_vm14  ;;  %v919_v55 = vadd.f32 %v918_v53, %v917_v52 }
 0xd33   :  { %vm1355_vm2 = vmpackc.low %vm1353_vm15, %vm1353_vm15 }
 0xd34   :  { %1357 = vmatmul.msk.bf16.vlgmr.msrb.gmra.mxu2 %vm1355_vm2, %v1356_v54  ;;  %vm1360_vm3 = vmpackc.low %vm1358_vm1, %vm1358_vm1  ;;  %920 = vadd.xlane.f32.xlu2 %v919_v55 }
 0xd35   :  { %1362 = vmatmul.msk.bf16.vlgmr.msrb.gmra.mxu3 %vm1360_vm3, %v1361_v56  ;;  %1150 = vmatpush.bf16.xpose.msrb.mxu2 %v1633_v3  ;;  %vm1209_vm3 = vcmask 1040384  }
 0xd36   :  { %1163 = vmatpush.bf16.xpose.msrb.mxu3 %v1635_v7 }
 0xd3d   :  { %1151 = vmatpush.bf16.xpose.msrb.mxu2 %v1638_v10 }
 0xd3e   :  { %1164 = vmatpush.bf16.xpose.msrb.mxu3 %v1642_v12 }
 0xda7   :  { %v921_v57 = vpop.xlane.xlu2 %920 }
 0xda8   :  { %1475 = vrcp.f32 %v921_v57 }
 0xdae   :  { %v1476_v61 = vpop.eup %1475 }
 0xdb7   :  { %v933_v58 = vpop.f32.mrf.mxu2 }
 0xdb8   :  { %v946_v59 = vpop.f32.mrf.mxu3 }
 0xdb9   :  { %v947_v60 = vadd.f32 %v946_v59, %v933_v58 }
 0xdbb   :  { %v951_v62 = vmul.f32 %v1476_v61, %v947_v60 }
 0xdbd   :  { %v952_v63 = vpack.c.bf16 %v951_v62, %v951_v62 }
 0xdbf   :  { %1363 = vmatmul.msk.bf16.vlgmr.msra.gmra.mxu0 %vm72_vm0, %v952_v63  ;;  %1364 = vmatmul.msk.bf16.vlgmr.msra.gmra.mxu1 %vm72_vm0, %v952_v63  ;;  %v935_v0 = vpop.f32.mrf.mxu2 }
 0xdc0   :  { %v948_v3 = vpop.f32.mrf.mxu3 }
 0xe3c   :  { %v965_v1 = vpop.f32.mrf.mxu0  ;;  %v978_v7 = vpop.f32.mrf.mxu1 }
 0xe3d   :  { %v982_v2 = vrot.slane %v965_v1, 4  ;;  %v988_v10 = vrot.slane %v978_v7, 4 }
 0xe3f   :  { %v983_v4 = vmax.f32 %v965_v1, %v982_v2  ;;  %v989_v12 = vmax.f32 %v978_v7, %v988_v10 }
 0xe41   :  { %v984_v5 = vrot.slane %v983_v4, 2  ;;  %v990_v6 = vrot.slane %v989_v12, 2 }
 0xe43   :  { %v985_v8 = vmax.f32 %v983_v4, %v984_v5  ;;  %v991_v9 = vmax.f32 %v989_v12, %v990_v6 }
 0xe44   :  { %v967_v11 = vpop.f32.mrf.mxu0  ;;  %v980_v13 = vpop.f32.mrf.mxu1 }
 0xe45   :  { %v986_v14 = vrot.slane %v985_v8, 1  ;;  %v992_v15 = vrot.slane %v991_v9, 1 }
 0xe47   :  { %v987_v16 = vmax.f32 %v985_v8, %v986_v14  ;;  %v993_v17 = vmax.f32 %v991_v9, %v992_v15 }
 0xe49   :  { %v994_v18 = vsub.f32 %v965_v1, %v987_v16  ;;  %v995_v19 = vsub.f32 %v978_v7, %v993_v17 }
 0xe4b   :  { %v996_v20 = vmul.f32 1.442695, %v994_v18  ;;  %v998_v21 = vmul.f32 1.442695, %v995_v19 }
 0xe4d   :  { %1477 = vpow2.f32 %v996_v20 }
 0xe4e   :  { %1479 = vpow2.f32 %v998_v21 }
 0xe53   :  { %v1478_v22 = vpop.eup %1477 }
 0xe54   :  { %v1480_v23 = vpop.eup %1479  ;;  %v1000_v24 = vrot.slane %v1478_v22, 4 }
 0xe55   :  { %v1006_v25 = vrot.slane %v1480_v23, 4 }
 0xe56   :  { %v1001_v26 = vadd.f32 %v1478_v22, %v1000_v24 }
 0xe57   :  { %v1007_v27 = vadd.f32 %v1480_v23, %v1006_v25 }
 0xe58   :  { %v1002_v28 = vrot.slane %v1001_v26, 2 }
 0xe59   :  { %v1008_v29 = vrot.slane %v1007_v27, 2 }
 0xe5a   :  { %v1003_v30 = vadd.f32 %v1002_v28, %v1001_v26 }
 0xe5b   :  { %v1009_v31 = vadd.f32 %v1008_v29, %v1007_v27 }
 0xe5c   :  { %v1004_v32 = vrot.slane %v1003_v30, 1 }
 0xe5d   :  { %v1010_v33 = vrot.slane %v1009_v31, 1 }
 0xe5e   :  { %v1005_v34 = vadd.f32 %v1004_v32, %v1003_v30 }
 0xe5f   :  { %v1011_v35 = vadd.f32 %v1010_v33, %v1009_v31 }
 0xe60   :  { %1481 = vrcp.f32 %v1005_v34 }
 0xe61   :  { %1483 = vrcp.f32 %v1011_v35 }
 0xe66   :  { %v1482_v36 = vpop.eup %1481 }
 0xe67   :  { %v1484_v37 = vpop.eup %1483  ;;  %v1014_v38 = vmul.f32 %v1482_v36, %v1478_v22 }
 0xe68   :  { %v1015_v39 = vmul.f32 %v1484_v37, %v1480_v23 }
 0xe69   :  { %v1368_v49 = vpack.c.bf16 %v1014_v38, %v1014_v38 }
 0xe6a   :  { %v1020_v40 = vmin.f32 %v1014_v38, %v1015_v39  ;;  %v1016_v41 = vmax.f32 %v1014_v38, %v1015_v39  ;;  %v1373_v51 = vpack.c.bf16 %v1015_v39, %v1015_v39 }
 0xe6c   :  { %1021 = vmin.xlane.f32.xlu1 %v1020_v40  ;;  %1017 = vmax.xlane.f32.xlu0 %v1016_v41 }
 0xedf   :  { %v1022_v42 = vpop.xlane.xlu1 %1021  ;;  %v1018_v43 = vpop.xlane.xlu0 %1017 }
 0xee0   :  { %v1023_v44 = vmul.f32 0.5, %v1022_v42  ;;  %v1019_v45 = vmul.f32 0.5, %v1018_v43  ;;  %v1184_v43 = vlaneseq }
 0xee2   :  { %v1024_v46 = vadd.f32 %v1023_v44, %v1019_v45 }
 0xee4   :  { %vm1025_vm4 = vcmp.lt.f32.partialorder %v1014_v38, %v1024_v46  ;;  %vm1026_vm5 = vcmp.lt.f32.partialorder %v1015_v39, %v1024_v46 }
 0xee5   :  { %vm1365_vm6 = vmneg %vm1025_vm4  ;;  %v1027_v47 = vsel %vm1025_vm4, 0.0, %v1014_v38  ;;  %v1028_v48 = vsel %vm1026_vm5, 0.0, %v1015_v39  ;;  %vm1213_vm4 = vcmp.lt.s32.totalorder %v1184_v43, 256 }
 0xee6   :  { %vm1370_vm7 = vmneg %vm1026_vm5  ;;  %v1029_v50 = vadd.f32 %v1028_v48, %v1027_v47  ;;  %v1185_v48 = vshrl.u32 %v1184_v43, 7 }
 0xee7   :  { %vm1367_vm8 = vmpackc.low %vm1365_vm6, %vm1365_vm6 }
 0xee8   :  { %1369 = vmatmul.msk.bf16.vlgmr.msra.gmra.mxu2 %vm1367_vm8, %v1368_v49  ;;  %vm1372_vm9 = vmpackc.low %vm1370_vm7, %vm1370_vm7  ;;  %1030 = vadd.xlane.f32.xlu2 %v1029_v50 }
 0xee9   :  { %1374 = vmatmul.msk.bf16.vlgmr.msra.gmra.mxu3 %vm1372_vm9, %v1373_v51 }
 0xf5b   :  { %v1031_v52 = vpop.xlane.xlu2 %1030 }
 0xf5c   :  { %1485 = vrcp.f32 %v1031_v52 }
 0xf62   :  { %v1486_v56 = vpop.eup %1485 }
 0xf6b   :  { %v1043_v53 = vpop.f32.mrf.mxu2 }
 0xf6c   :  { %v1056_v54 = vpop.f32.mrf.mxu3 }
 0xf6d   :  { %v1057_v55 = vadd.f32 %v1056_v54, %v1043_v53 }
 0xf6f   :  { %v1061_v57 = vmul.f32 %v1486_v56, %v1057_v55 }
 0xf71   :  { %v1062_v58 = vpack.c.bf16 %v1061_v57, %v1061_v57 }
 0xf73   :  { %1375 = vmatmul.msk.bf16.vlgmr.msrb.gmra.mxu0 %vm72_vm0, %v1062_v58  ;;  %1376 = vmatmul.msk.bf16.vlgmr.msrb.gmra.mxu1 %vm72_vm0, %v1062_v58  ;;  %v1045_v59 = vpop.f32.mrf.mxu2 }
 0xf74   :  { %v1058_v60 = vpop.f32.mrf.mxu3 }
 0xff0   :  { %v1075_v61 = vpop.f32.mrf.mxu0  ;;  %v1088_v62 = vpop.f32.mrf.mxu1 }
 0xff1   :  { %v1092_v63 = vrot.slane %v1075_v61, 4  ;;  %v1098_v0 = vrot.slane %v1088_v62, 4 }
 0xff3   :  { %v1093_v3 = vmax.f32 %v1075_v61, %v1092_v63  ;;  %v1099_v1 = vmax.f32 %v1088_v62, %v1098_v0 }
 0xff5   :  { %v1094_v7 = vrot.slane %v1093_v3, 2  ;;  %v1100_v2 = vrot.slane %v1099_v1, 2 }
 0xff7   :  { %v1095_v10 = vmax.f32 %v1093_v3, %v1094_v7  ;;  %v1101_v4 = vmax.f32 %v1099_v1, %v1100_v2 }
 0xff8   :  { %v1077_v12 = vpop.f32.mrf.mxu0  ;;  %v1090_v5 = vpop.f32.mrf.mxu1 }
 0xff9   :  { %v1096_v6 = vrot.slane %v1095_v10, 1  ;;  %v1102_v8 = vrot.slane %v1101_v4, 1 }
 0xffb   :  { %v1097_v9 = vmax.f32 %v1095_v10, %v1096_v6  ;;  %v1103_v11 = vmax.f32 %v1101_v4, %v1102_v8 }
 0xffd   :  { %v1104_v13 = vsub.f32 %v1075_v61, %v1097_v9  ;;  %v1105_v14 = vsub.f32 %v1088_v62, %v1103_v11 }
 0xfff   :  { %v1106_v15 = vmul.f32 1.442695, %v1104_v13  ;;  %v1108_v16 = vmul.f32 1.442695, %v1105_v14 }
0x1001   :  { %1487 = vpow2.f32 %v1106_v15 }
0x1002   :  { %1489 = vpow2.f32 %v1108_v16 }
0x1007   :  { %v1488_v17 = vpop.eup %1487 }
0x1008   :  { %v1490_v18 = vpop.eup %1489  ;;  %v1110_v19 = vrot.slane %v1488_v17, 4 }
0x1009   :  { %v1116_v20 = vrot.slane %v1490_v18, 4 }
0x100a   :  { %v1111_v21 = vadd.f32 %v1488_v17, %v1110_v19 }
0x100b   :  { %v1117_v22 = vadd.f32 %v1490_v18, %v1116_v20 }
0x100c   :  { %v1112_v23 = vrot.slane %v1111_v21, 2 }
0x100d   :  { %v1118_v24 = vrot.slane %v1117_v22, 2 }
0x100e   :  { %v1113_v25 = vadd.f32 %v1112_v23, %v1111_v21 }
0x100f   :  { %v1119_v26 = vadd.f32 %v1118_v24, %v1117_v22 }
0x1010   :  { %v1114_v27 = vrot.slane %v1113_v25, 1 }
0x1011   :  { %v1120_v28 = vrot.slane %v1119_v26, 1 }
0x1012   :  { %v1115_v29 = vadd.f32 %v1114_v27, %v1113_v25 }
0x1013   :  { %v1121_v30 = vadd.f32 %v1120_v28, %v1119_v26 }
0x1014   :  { %1491 = vrcp.f32 %v1115_v29 }
0x1015   :  { %1493 = vrcp.f32 %v1121_v30 }
0x101a   :  { %v1492_v31 = vpop.eup %1491 }
0x101b   :  { %v1494_v32 = vpop.eup %1493  ;;  %v1124_v33 = vmul.f32 %v1492_v31, %v1488_v17 }
0x101c   :  { %v1741_v34 = vmul.f32 %v1494_v32, %v1490_v18 }
0x101d   :  { %v1172_v35 = vrot.slane %v1124_v33, 4  ;;  %v1380_v5 = vpack.c.bf16 %v1124_v33, %v1124_v33 }
0x101e   :  { %v1130_v36 = vmin.f32 %v1124_v33, %v1741_v34  ;;  %v1126_v37 = vmax.f32 %v1124_v33, %v1741_v34  ;;  %v1178_v38 = vrot.slane %v1741_v34, 4  ;;  %v1385_v11 = vpack.c.bf16 %v1741_v34, %v1741_v34 }
0x101f   :  { %v1173_v39 = vmax.f32 %v1124_v33, %v1172_v35 }
0x1020   :  { %1131 = vmin.xlane.f32.xlu1 %v1130_v36  ;;  %1127 = vmax.xlane.f32.xlu0 %v1126_v37  ;;  %v1179_v40 = vmax.f32 %v1741_v34, %v1178_v38 }
0x1021   :  { %v1174_v41 = vrot.slane %v1173_v39, 2 }
0x1022   :  { %v1180_v42 = vrot.slane %v1179_v40, 2 }
0x1023   :  { %v1175_v44 = vmax.f32 %v1173_v39, %v1174_v41 }
0x1024   :  { %v1181_v45 = vmax.f32 %v1179_v40, %v1180_v42 }
0x1025   :  { %v1176_v46 = vrot.slane %v1175_v44, 1 }
0x1026   :  { %v1182_v47 = vrot.slane %v1181_v45, 1 }
0x1027   :  { %v1177_v49 = vmax.f32 %v1175_v44, %v1176_v46 }
0x1028   :  { %v1183_v50 = vmax.f32 %v1181_v45, %v1182_v47 }
0x1029   :  { %vm1186_vm10 = vcmp.eq.f32.partialorder %v1124_v33, %v1177_v49 }
0x102a   :  { %vm1187_vm11 = vcmp.eq.f32.partialorder %v1741_v34, %v1183_v50  ;;  %v1188_v51 = vsel %vm1186_vm10, %v1185_v48, 8 }
0x102b   :  { %v1189_v52 = vsel %vm1187_vm11, %v1185_v48, 8  ;;  %v1190_v53 = vrot.slane %v1188_v51, 4 }
0x102c   :  { %v1199_v54 = vrot.slane %v1189_v52, 4 }
0x102d   :  { %vm1191_vm12 = vcmp.lt.s32.totalorder %v1188_v51, %v1190_v53 }
0x102e   :  { %v1192_v55 = vsel %vm1191_vm12, %v1188_v51, %v1190_v53  ;;  %vm1200_vm13 = vcmp.lt.s32.totalorder %v1189_v52, %v1199_v54 }
0x102f   :  { %v1193_v56 = vrot.slane %v1192_v55, 2  ;;  %v1201_v57 = vsel %vm1200_vm13, %v1189_v52, %v1199_v54 }
0x1030   :  { %v1202_v58 = vrot.slane %v1201_v57, 2 }
0x1031   :  { %vm1194_vm14 = vcmp.lt.s32.totalorder %v1192_v55, %v1193_v56 }
0x1032   :  { %v1195_v59 = vsel %vm1194_vm14, %v1192_v55, %v1193_v56  ;;  %vm1203_vm15 = vcmp.lt.s32.totalorder %v1201_v57, %v1202_v58 }
0x1033   :  { %v1196_v60 = vrot.slane %v1195_v59, 1  ;;  %v1204_v61 = vsel %vm1203_vm15, %v1201_v57, %v1202_v58 }
0x1034   :  { %v1205_v62 = vrot.slane %v1204_v61, 1 }
0x1035   :  { %vm1197_vm1 = vcmp.lt.s32.totalorder %v1195_v59, %v1196_v60 }
0x1036   :  { %vm1206_vm2 = vcmp.lt.s32.totalorder %v1204_v61, %v1205_v62  ;;  %v1198_v3 = vsel %vm1197_vm1, %v1195_v59, %v1196_v60 }
0x1037   :  { %v1207_v63 = vsel %vm1206_vm2, %v1204_v61, %v1205_v62 }
0x1038   :  { %v1208_v0 = vrot.slane %v1207_v63, 7 }
0x103a   :  { %v1210_v1 = vsel %vm1209_vm3, %v1198_v3, %v1208_v0 }
0x103b   :  { %1215 = vst.msk [vmem:[#allocation7] sm:$0x3] %vm1213_vm4, %v1210_v1 }
0x103c   :  { %1227 = dma.vmem_to_hbm [thread:$0]  %s1223_s1, 32, %s1225_s26, [#allocation4]  }
0x1093   :  { %v1132_v7 = vpop.xlane.xlu1 %1131  ;;  %v1128_v2 = vpop.xlane.xlu0 %1127 }
0x1094   :  { %v1133_v10 = vmul.f32 0.5, %v1132_v7  ;;  %v1129_v4 = vmul.f32 0.5, %v1128_v2 }
0x1096   :  { %v1134_v12 = vadd.f32 %v1133_v10, %v1129_v4 }
0x1098   :  { %vm1135_vm5 = vcmp.lt.f32.partialorder %v1124_v33, %v1134_v12  ;;  %vm1136_vm6 = vcmp.lt.f32.partialorder %v1741_v34, %v1134_v12 }
0x1099   :  { %vm1377_vm7 = vmneg %vm1135_vm5  ;;  %v1137_v6 = vsel %vm1135_vm5, 0.0, %v1124_v33  ;;  %v1138_v8 = vsel %vm1136_vm6, 0.0, %v1741_v34 }
0x109a   :  { %vm1379_vm8 = vmpackc.low %vm1377_vm7, %vm1377_vm7  ;;  %v1139_v9 = vadd.f32 %v1138_v8, %v1137_v6 }
0x109b   :  { %vm1382_vm9 = vmneg %vm1136_vm6  ;;  %1381 = vmatmul.msk.bf16.vlgmr.msrb.gmra.mxu2 %vm1379_vm8, %v1380_v5 }
0x109c   :  { %vm1384_vm10 = vmpackc.low %vm1382_vm9, %vm1382_vm9  ;;  %1140 = vadd.xlane.f32.xlu2 %v1139_v9 }
0x109d   :  { %1386 = vmatmul.msk.bf16.vlgmr.msrb.gmra.mxu3 %vm1384_vm10, %v1385_v11 }
0x110f   :  { %v1141_v13 = vpop.xlane.xlu2 %1140 }
0x1110   :  { %1495 = vrcp.f32 %v1141_v13 }
0x1116   :  { %v1496_v17 = vpop.eup %1495 }
0x111e   :  { %v1153_v14 = vpop.f32.mrf.mxu2 }
0x1120   :  { %v1166_v15 = vpop.f32.mrf.mxu3 }
0x1121   :  { %v1167_v16 = vadd.f32 %v1166_v15, %v1153_v14 }
0x1123   :  { %v1171_v18 = vmul.f32 %v1496_v17, %v1167_v16 }
0x1125   :  { %1216 = vst.msk [vmem:[#allocation8] sm:$0xff] %vm72_vm0, %v1171_v18 }
0x1126   :  { %v1155_v19 = vpop.f32.mrf.mxu2  ;;  %1238 = dma.vmem_to_hbm [thread:$0]  %s1234_s28, 128, %s1236_s4, [#allocation9]  }
0x1128   :  { %v1168_v20 = vpop.f32.mrf.mxu3 }
0x1129   :  { %1597 = dma.done.wait [#allocation4], 32  }
0x112a   :  { %1598 = vsyncadd [#allocation4], 4294967264 }
0x112b   :  { %1599 = dma.done.wait [#allocation9], 128  }
0x112c   :  { %1600 = vsyncadd [#allocation9], 4294967168 }
0x112d   :  { %1247 = vsyncpa [#allocation3], 1 }
0x112e   :  { %1248 = vsyncpa [#allocation6], 1 }
0x112f   :  { %1249 = vsyncpa [#allocation4], 1 }
0x1130   :  { %1250 = vsyncpa [#allocation9], 1 }

</bundles_post_ra>
